<compile_context>
chip_gen: v7x
topology: tpu7x:2x2x1
jax: 0.10.0
libtpu: 0.0.40
codegen_flags: <defaults>
</compile_context>

<pallas_src>
import jax
import jax.numpy as jnp
from jax.experimental import pallas as pl
from jax.experimental.pallas import tpu as pltpu

EPS = 1e-5


def _make_kernel(H, W):
    HW = H * W
    PAD = W + 1  # enough zeros to cover any 3x3 tap shift of the flattened image

    def kernel(x_ref, w1_ref, w2_ref, out_ref):
        # x_ref, out_ref: (NB, C, H*W)   w1_ref, w2_ref: (C, 9*C)
        NB, C, _ = x_ref.shape

        # Column index of every output pixel, used to mask the row-wrap that a +-1
        # column shift produces on the flattened spatial axis.
        col = jax.lax.broadcasted_iota(jnp.int32, (1, HW), 1) % W
        not_first_col = col >= 1
        not_last_col = col < (W - 1)

        w1 = w1_ref[...].astype(jnp.float32)
        w2 = w2_ref[...].astype(jnp.float32)

        zpad = jnp.zeros((C, PAD), jnp.float32)

        def conv3x3(act, wmat):
            # act: (C, HW) channels-major flattened image (f32).
            # Zero-extend the flat image so out-of-range row taps read zeros,
            # then take 9 shifted views and fold all taps into ONE matmul.
            buf = jnp.concatenate([zpad, act, zpad], axis=1)  # (C, HW + 2*PAD)
            taps = []
            for oy in (-1, 0, 1):
                for ox in (-1, 0, 1):
                    start = PAD + oy * W + ox
                    t = buf[:, start:start + HW]              # shifted image view
                    if ox == -1:                              # mask column wrap-around
                        t = jnp.where(not_first_col, t, 0.0)
                    elif ox == 1:
                        t = jnp.where(not_last_col, t, 0.0)
                    taps.append(t)
            s = jnp.concatenate(taps, axis=0)                 # (9C, HW) im2col slab
            # Single MXU matmul per conv, lane-dense (C, HW) result.
            return jnp.dot(wmat, s, preferred_element_type=jnp.float32)

        def instance_norm(y):
            # Per-channel stats over the lane-dense spatial axis; biased variance.
            mean = jnp.mean(y, axis=1, keepdims=True)
            cent = y - mean
            var = jnp.mean(cent * cent, axis=1, keepdims=True)
            return cent * jax.lax.rsqrt(var + EPS)

        for i in range(NB):                                   # static unroll over the block
            x = x_ref[i].astype(jnp.float32)                  # (C, HW), aligned read
            h = jnp.maximum(instance_norm(conv3x3(x, w1)), 0.0)
            y = instance_norm(conv3x3(h, w2)) + x             # residual from aligned x
            out_ref[i] = jnp.maximum(y, 0.0).astype(out_ref.dtype)

    return kernel


def basic_block(x_nchw, w1, w2, *, batch_block=None):
    """x_nchw: (N, C, H, W) float32; w1, w2: (3, 3, C, C) HWIO conv weights."""
    N, C, H, W = x_nchw.shape
    HW = H * W
    if batch_block is None:
        # Whole batch in one grid step at toy sizes. For large N / H*W*C (or v7x's
        # 64 MiB VMEM), pick batch_block so each step fits VMEM and the grid has
        # >= 2 parallel steps for megacore sharding.
        batch_block = N
    assert N % batch_block == 0, "batch_block must divide N"

    x = x_nchw.reshape(N, C, HW)            # free reshape: no transpose, no pad pass
    w1m = w1.reshape(9 * C, C).T            # (C, 9C); rows match im2col tap order
    w2m = w2.reshape(9 * C, C).T

    out = pl.pallas_call(
        _make_kernel(H, W),
        out_shape=jax.ShapeDtypeStruct((N, C, HW), x_nchw.dtype),
        grid=(N // batch_block,),
        in_specs=[
            pl.BlockSpec((batch_block, C, HW), lambda b: (b, 0, 0)),
            pl.BlockSpec((C, 9 * C), lambda b: (0, 0)),
            pl.BlockSpec((C, 9 * C), lambda b: (0, 0)),
        ],
        out_specs=pl.BlockSpec((batch_block, C, HW), lambda b: (b, 0, 0)),
        compiler_params=pltpu.CompilerParams(
            dimension_semantics=("parallel",),
            vmem_limit_bytes=32 * 1024 * 1024,
        ),
    )(x, w1m, w2m)

    return out.reshape(N, C, H, W)          # free reshape back to NCHW


def basic_block_ref(x_nchw, w1, w2):
    # Pure-JAX reference (matches PyTorch BasicBlock with InstanceNorm2d defaults).
    x = jnp.transpose(x_nchw, (0, 2, 3, 1))

    def conv(y, w):
        return jax.lax.conv_general_dilated(
            y, w, window_strides=(1, 1), padding="SAME",
            dimension_numbers=("NHWC", "HWIO", "NHWC"))

    def inorm(y):
        mean = jnp.mean(y, axis=(1, 2), keepdims=True)
        var = jnp.var(y, axis=(1, 2), keepdims=True)
        return (y - mean) * jax.lax.rsqrt(var + EPS)

    out = jax.nn.relu(inorm(conv(x, w1)))
    out = inorm(conv(out, w2)) + x
    out = jax.nn.relu(out)
    return jnp.transpose(out, (0, 3, 1, 2))


if __name__ == "__main__":
    N, C, H, W = 2, 4, 16, 16

    key = jax.random.PRNGKey(0)
    kx, k1, k2 = jax.random.split(key, 3)
    x = jax.random.normal(kx, (N, C, H, W), dtype=jnp.float32)
    # Deterministic "kaiming-ish" init; layout (kh, kw, Cin, Cout).
    scale = (2.0 / (3 * 3 * C)) ** 0.5
    w1 = scale * jax.random.normal(k1, (3, 3, C, C), dtype=jnp.float32)
    w2 = scale * jax.random.normal(k2, (3, 3, C, C), dtype=jnp.float32)

    out = jax.block_until_ready(basic_block(x, w1, w2))
    ref = jax.block_until_ready(basic_block_ref(x, w1, w2))

    assert out.shape == (N, C, H, W)
    assert jnp.allclose(out, ref, atol=1e-4, rtol=1e-4), "mismatch vs reference"
    print("KERNEL_OK")
</pallas_src>

<mosaic_0001>
module attributes {stable_mosaic.version = 11 : i64} {
  func.func @kernel(%arg0: i32, %arg1: memref<2x4x256xf32, #tpu.memory_space<vmem>>, %arg2: memref<4x36xf32, #tpu.memory_space<vmem>>, %arg3: memref<4x36xf32, #tpu.memory_space<vmem>>, %arg4: memref<2x4x256xf32, #tpu.memory_space<vmem>>) attributes {dimension_semantics = [#tpu.dimension_semantics<parallel>], iteration_bounds = array<i64: 1>, scalar_prefetch = 0 : i64, scratch_operands = 0 : i64, tpu.core_type = #tpu.core_type<tc>, window_params = [{transform_indices = @transform_0, window_bounds = array<i64: 2, 4, 256>}, {pipeline_mode = #tpu.pipeline_mode<synchronous>, transform_indices = @transform_1, window_bounds = array<i64: 4, 36>}, {pipeline_mode = #tpu.pipeline_mode<synchronous>, transform_indices = @transform_2, window_bounds = array<i64: 4, 36>}, {transform_indices = @transform_3, window_bounds = array<i64: 2, 4, 256>}]} {
    %0 = tpu.iota {dimensions = array<i32: 1>} : vector<1x256xi32>
    %c16_i32 = arith.constant 16 : i32
    %c0_i32 = arith.constant 0 : i32
    %1 = arith.cmpi eq, %c16_i32, %c0_i32 : i32
    %c1_i32 = arith.constant 1 : i32
    %2 = arith.select %1, %c1_i32, %c16_i32 : i32
    %3 = vector.broadcast %2 : i32 to vector<1x256xi32>
    %4 = arith.remsi %0, %3 : vector<1x256xi32>
    %c0_i32_0 = arith.constant 0 : i32
    %5 = vector.broadcast %c0_i32_0 : i32 to vector<1x256xi32>
    %6 = arith.cmpi ne, %4, %5 : vector<1x256xi32>
    %c0_i32_1 = arith.constant 0 : i32
    %7 = vector.broadcast %c0_i32_1 : i32 to vector<1x256xi32>
    %8 = arith.cmpi slt, %4, %7 : vector<1x256xi32>
    %c0_i32_2 = arith.constant 0 : i32
    %9 = arith.cmpi slt, %2, %c0_i32_2 : i32
    %10 = vector.broadcast %9 : i1 to vector<1x256xi1>
    %11 = vector.broadcast %10 : vector<1x256xi1> to vector<1x256xi1>
    %12 = arith.xori %8, %11 : vector<1x256xi1>
    %13 = arith.andi %12, %6 : vector<1x256xi1>
    %14 = vector.broadcast %2 : i32 to vector<1x256xi32>
    %15 = arith.addi %4, %14 : vector<1x256xi32>
    %16 = arith.select %13, %15, %4 : vector<1x256xi1>, vector<1x256xi32>
    %c1_i32_3 = arith.constant 1 : i32
    %17 = vector.broadcast %c1_i32_3 : i32 to vector<1x256xi32>
    %18 = arith.cmpi sge, %16, %17 : vector<1x256xi32>
    %c15_i32 = arith.constant 15 : i32
    %19 = vector.broadcast %c15_i32 : i32 to vector<1x256xi32>
    %20 = arith.cmpi slt, %16, %19 : vector<1x256xi32>
    %c0 = arith.constant 0 : index
    %c0_4 = arith.constant 0 : index
    %21 = vector.load %arg2[%c0, %c0_4] : memref<4x36xf32, #tpu.memory_space<vmem>>, vector<4x36xf32>
    %c0_5 = arith.constant 0 : index
    %c0_6 = arith.constant 0 : index
    %22 = vector.load %arg3[%c0_5, %c0_6] : memref<4x36xf32, #tpu.memory_space<vmem>>, vector<4x36xf32>
    %cst = arith.constant 0.000000e+00 : f32
    %23 = vector.broadcast %cst : f32 to vector<4x17xf32>
    %c0_7 = arith.constant 0 : index
    %c0_8 = arith.constant 0 : index
    %c0_9 = arith.constant 0 : index
    %24 = vector.load %arg1[%c0_7, %c0_8, %c0_9] : memref<2x4x256xf32, #tpu.memory_space<vmem>>, vector<1x4x256xf32>
    %25 = vector.shape_cast %24 : vector<1x4x256xf32> to vector<4x256xf32>
    %26 = tpu.concatenate %23, %25, %23 in 1 : vector<4x17xf32>, vector<4x256xf32>, vector<4x17xf32> -> vector<4x290xf32>
    %27 = vector.extract_strided_slice %26 {offsets = [0, 0], sizes = [4, 256], strides = [1, 1]} : vector<4x290xf32> to vector<4x256xf32>
    %cst_10 = arith.constant 0.000000e+00 : f32
    %28 = vector.shape_cast %18 : vector<1x256xi1> to vector<1x256xi1>
    %29 = vector.broadcast %28 : vector<1x256xi1> to vector<4x256xi1>
    %30 = vector.broadcast %cst_10 : f32 to vector<4x256xf32>
    %31 = arith.select %29, %27, %30 : vector<4x256xi1>, vector<4x256xf32>
    %32 = vector.extract_strided_slice %26 {offsets = [0, 1], sizes = [4, 256], strides = [1, 1]} : vector<4x290xf32> to vector<4x256xf32>
    %33 = vector.extract_strided_slice %26 {offsets = [0, 2], sizes = [4, 256], strides = [1, 1]} : vector<4x290xf32> to vector<4x256xf32>
    %cst_11 = arith.constant 0.000000e+00 : f32
    %34 = vector.shape_cast %20 : vector<1x256xi1> to vector<1x256xi1>
    %35 = vector.broadcast %34 : vector<1x256xi1> to vector<4x256xi1>
    %36 = vector.broadcast %cst_11 : f32 to vector<4x256xf32>
    %37 = arith.select %35, %33, %36 : vector<4x256xi1>, vector<4x256xf32>
    %38 = vector.extract_strided_slice %26 {offsets = [0, 16], sizes = [4, 256], strides = [1, 1]} : vector<4x290xf32> to vector<4x256xf32>
    %cst_12 = arith.constant 0.000000e+00 : f32
    %39 = vector.shape_cast %18 : vector<1x256xi1> to vector<1x256xi1>
    %40 = vector.broadcast %39 : vector<1x256xi1> to vector<4x256xi1>
    %41 = vector.broadcast %cst_12 : f32 to vector<4x256xf32>
    %42 = arith.select %40, %38, %41 : vector<4x256xi1>, vector<4x256xf32>
    %43 = vector.extract_strided_slice %26 {offsets = [0, 17], sizes = [4, 256], strides = [1, 1]} : vector<4x290xf32> to vector<4x256xf32>
    %44 = vector.extract_strided_slice %26 {offsets = [0, 18], sizes = [4, 256], strides = [1, 1]} : vector<4x290xf32> to vector<4x256xf32>
    %cst_13 = arith.constant 0.000000e+00 : f32
    %45 = vector.shape_cast %20 : vector<1x256xi1> to vector<1x256xi1>
    %46 = vector.broadcast %45 : vector<1x256xi1> to vector<4x256xi1>
    %47 = vector.broadcast %cst_13 : f32 to vector<4x256xf32>
    %48 = arith.select %46, %44, %47 : vector<4x256xi1>, vector<4x256xf32>
    %49 = vector.extract_strided_slice %26 {offsets = [0, 32], sizes = [4, 256], strides = [1, 1]} : vector<4x290xf32> to vector<4x256xf32>
    %cst_14 = arith.constant 0.000000e+00 : f32
    %50 = vector.shape_cast %18 : vector<1x256xi1> to vector<1x256xi1>
    %51 = vector.broadcast %50 : vector<1x256xi1> to vector<4x256xi1>
    %52 = vector.broadcast %cst_14 : f32 to vector<4x256xf32>
    %53 = arith.select %51, %49, %52 : vector<4x256xi1>, vector<4x256xf32>
    %54 = vector.extract_strided_slice %26 {offsets = [0, 33], sizes = [4, 256], strides = [1, 1]} : vector<4x290xf32> to vector<4x256xf32>
    %55 = vector.extract_strided_slice %26 {offsets = [0, 34], sizes = [4, 256], strides = [1, 1]} : vector<4x290xf32> to vector<4x256xf32>
    %cst_15 = arith.constant 0.000000e+00 : f32
    %56 = vector.shape_cast %20 : vector<1x256xi1> to vector<1x256xi1>
    %57 = vector.broadcast %56 : vector<1x256xi1> to vector<4x256xi1>
    %58 = vector.broadcast %cst_15 : f32 to vector<4x256xf32>
    %59 = arith.select %57, %55, %58 : vector<4x256xi1>, vector<4x256xf32>
    %60 = tpu.concatenate %31, %32, %37, %42, %43, %48, %53, %54, %59 in 0 : vector<4x256xf32>, vector<4x256xf32>, vector<4x256xf32>, vector<4x256xf32>, vector<4x256xf32>, vector<4x256xf32>, vector<4x256xf32>, vector<4x256xf32>, vector<4x256xf32> -> vector<36x256xf32>
    %cst_16 = arith.constant dense<0.000000e+00> : vector<4x256xf32>
    %61 = tpu.matmul %21, %60, %cst_16 {dimension_numbers = #tpu.dot_dimension_numbers<[1], [0], [0], [1], [0, 0, 1, 1], [], []>} : vector<4x36xf32>, vector<36x256xf32>, vector<4x256xf32> -> vector<4x256xf32>
    %cst_17 = arith.constant dense<0.000000e+00> : vector<4xf32>
    %62 = vector.multi_reduction <add>, %61, %cst_17 [1] : vector<4x256xf32> to vector<4xf32>
    %63 = vector.shape_cast %62 : vector<4xf32> to vector<4x1xf32>
    %cst_18 = arith.constant 2.560000e+02 : f32
    %64 = vector.broadcast %cst_18 : f32 to vector<4x1xf32>
    %65 = arith.divf %63, %64 : vector<4x1xf32>
    %66 = vector.broadcast %65 : vector<4x1xf32> to vector<4x256xf32>
    %67 = arith.subf %61, %66 : vector<4x256xf32>
    %68 = arith.mulf %67, %67 : vector<4x256xf32>
    %cst_19 = arith.constant dense<0.000000e+00> : vector<4xf32>
    %69 = vector.multi_reduction <add>, %68, %cst_19 [1] : vector<4x256xf32> to vector<4xf32>
    %70 = vector.shape_cast %69 : vector<4xf32> to vector<4x1xf32>
    %cst_20 = arith.constant 2.560000e+02 : f32
    %71 = vector.broadcast %cst_20 : f32 to vector<4x1xf32>
    %72 = arith.divf %70, %71 : vector<4x1xf32>
    %cst_21 = arith.constant 9.99999974E-6 : f32
    %73 = vector.broadcast %cst_21 : f32 to vector<4x1xf32>
    %74 = arith.addf %72, %73 : vector<4x1xf32>
    %75 = math.rsqrt %74 : vector<4x1xf32>
    %76 = vector.broadcast %75 : vector<4x1xf32> to vector<4x256xf32>
    %77 = arith.mulf %67, %76 : vector<4x256xf32>
    %cst_22 = arith.constant 0.000000e+00 : f32
    %78 = vector.broadcast %cst_22 : f32 to vector<4x256xf32>
    %79 = arith.maximumf %77, %78 : vector<4x256xf32>
    %80 = tpu.concatenate %23, %79, %23 in 1 : vector<4x17xf32>, vector<4x256xf32>, vector<4x17xf32> -> vector<4x290xf32>
    %81 = vector.extract_strided_slice %80 {offsets = [0, 0], sizes = [4, 256], strides = [1, 1]} : vector<4x290xf32> to vector<4x256xf32>
    %cst_23 = arith.constant 0.000000e+00 : f32
    %82 = vector.shape_cast %18 : vector<1x256xi1> to vector<1x256xi1>
    %83 = vector.broadcast %82 : vector<1x256xi1> to vector<4x256xi1>
    %84 = vector.broadcast %cst_23 : f32 to vector<4x256xf32>
    %85 = arith.select %83, %81, %84 : vector<4x256xi1>, vector<4x256xf32>
    %86 = vector.extract_strided_slice %80 {offsets = [0, 1], sizes = [4, 256], strides = [1, 1]} : vector<4x290xf32> to vector<4x256xf32>
    %87 = vector.extract_strided_slice %80 {offsets = [0, 2], sizes = [4, 256], strides = [1, 1]} : vector<4x290xf32> to vector<4x256xf32>
    %cst_24 = arith.constant 0.000000e+00 : f32
    %88 = vector.shape_cast %20 : vector<1x256xi1> to vector<1x256xi1>
    %89 = vector.broadcast %88 : vector<1x256xi1> to vector<4x256xi1>
    %90 = vector.broadcast %cst_24 : f32 to vector<4x256xf32>
    %91 = arith.select %89, %87, %90 : vector<4x256xi1>, vector<4x256xf32>
    %92 = vector.extract_strided_slice %80 {offsets = [0, 16], sizes = [4, 256], strides = [1, 1]} : vector<4x290xf32> to vector<4x256xf32>
    %cst_25 = arith.constant 0.000000e+00 : f32
    %93 = vector.shape_cast %18 : vector<1x256xi1> to vector<1x256xi1>
    %94 = vector.broadcast %93 : vector<1x256xi1> to vector<4x256xi1>
    %95 = vector.broadcast %cst_25 : f32 to vector<4x256xf32>
    %96 = arith.select %94, %92, %95 : vector<4x256xi1>, vector<4x256xf32>
    %97 = vector.extract_strided_slice %80 {offsets = [0, 17], sizes = [4, 256], strides = [1, 1]} : vector<4x290xf32> to vector<4x256xf32>
    %98 = vector.extract_strided_slice %80 {offsets = [0, 18], sizes = [4, 256], strides = [1, 1]} : vector<4x290xf32> to vector<4x256xf32>
    %cst_26 = arith.constant 0.000000e+00 : f32
    %99 = vector.shape_cast %20 : vector<1x256xi1> to vector<1x256xi1>
    %100 = vector.broadcast %99 : vector<1x256xi1> to vector<4x256xi1>
    %101 = vector.broadcast %cst_26 : f32 to vector<4x256xf32>
    %102 = arith.select %100, %98, %101 : vector<4x256xi1>, vector<4x256xf32>
    %103 = vector.extract_strided_slice %80 {offsets = [0, 32], sizes = [4, 256], strides = [1, 1]} : vector<4x290xf32> to vector<4x256xf32>
    %cst_27 = arith.constant 0.000000e+00 : f32
    %104 = vector.shape_cast %18 : vector<1x256xi1> to vector<1x256xi1>
    %105 = vector.broadcast %104 : vector<1x256xi1> to vector<4x256xi1>
    %106 = vector.broadcast %cst_27 : f32 to vector<4x256xf32>
    %107 = arith.select %105, %103, %106 : vector<4x256xi1>, vector<4x256xf32>
    %108 = vector.extract_strided_slice %80 {offsets = [0, 33], sizes = [4, 256], strides = [1, 1]} : vector<4x290xf32> to vector<4x256xf32>
    %109 = vector.extract_strided_slice %80 {offsets = [0, 34], sizes = [4, 256], strides = [1, 1]} : vector<4x290xf32> to vector<4x256xf32>
    %cst_28 = arith.constant 0.000000e+00 : f32
    %110 = vector.shape_cast %20 : vector<1x256xi1> to vector<1x256xi1>
    %111 = vector.broadcast %110 : vector<1x256xi1> to vector<4x256xi1>
    %112 = vector.broadcast %cst_28 : f32 to vector<4x256xf32>
    %113 = arith.select %111, %109, %112 : vector<4x256xi1>, vector<4x256xf32>
    %114 = tpu.concatenate %85, %86, %91, %96, %97, %102, %107, %108, %113 in 0 : vector<4x256xf32>, vector<4x256xf32>, vector<4x256xf32>, vector<4x256xf32>, vector<4x256xf32>, vector<4x256xf32>, vector<4x256xf32>, vector<4x256xf32>, vector<4x256xf32> -> vector<36x256xf32>
    %cst_29 = arith.constant dense<0.000000e+00> : vector<4x256xf32>
    %115 = tpu.matmul %22, %114, %cst_29 {dimension_numbers = #tpu.dot_dimension_numbers<[1], [0], [0], [1], [0, 0, 1, 1], [], []>} : vector<4x36xf32>, vector<36x256xf32>, vector<4x256xf32> -> vector<4x256xf32>
    %cst_30 = arith.constant dense<0.000000e+00> : vector<4xf32>
    %116 = vector.multi_reduction <add>, %115, %cst_30 [1] : vector<4x256xf32> to vector<4xf32>
    %117 = vector.shape_cast %116 : vector<4xf32> to vector<4x1xf32>
    %cst_31 = arith.constant 2.560000e+02 : f32
    %118 = vector.broadcast %cst_31 : f32 to vector<4x1xf32>
    %119 = arith.divf %117, %118 : vector<4x1xf32>
    %120 = vector.broadcast %119 : vector<4x1xf32> to vector<4x256xf32>
    %121 = arith.subf %115, %120 : vector<4x256xf32>
    %122 = arith.mulf %121, %121 : vector<4x256xf32>
    %cst_32 = arith.constant dense<0.000000e+00> : vector<4xf32>
    %123 = vector.multi_reduction <add>, %122, %cst_32 [1] : vector<4x256xf32> to vector<4xf32>
    %124 = vector.shape_cast %123 : vector<4xf32> to vector<4x1xf32>
    %cst_33 = arith.constant 2.560000e+02 : f32
    %125 = vector.broadcast %cst_33 : f32 to vector<4x1xf32>
    %126 = arith.divf %124, %125 : vector<4x1xf32>
    %cst_34 = arith.constant 9.99999974E-6 : f32
    %127 = vector.broadcast %cst_34 : f32 to vector<4x1xf32>
    %128 = arith.addf %126, %127 : vector<4x1xf32>
    %129 = math.rsqrt %128 : vector<4x1xf32>
    %130 = vector.broadcast %129 : vector<4x1xf32> to vector<4x256xf32>
    %131 = arith.mulf %121, %130 : vector<4x256xf32>
    %132 = arith.addf %131, %25 : vector<4x256xf32>
    %cst_35 = arith.constant 0.000000e+00 : f32
    %133 = vector.broadcast %cst_35 : f32 to vector<4x256xf32>
    %134 = arith.maximumf %132, %133 : vector<4x256xf32>
    %c0_36 = arith.constant 0 : index
    %c0_37 = arith.constant 0 : index
    %c0_38 = arith.constant 0 : index
    %135 = vector.load %arg4[%c0_36, %c0_37, %c0_38] : memref<2x4x256xf32, #tpu.memory_space<vmem>>, vector<1x4x256xf32>
    %136 = vector.shape_cast %135 : vector<1x4x256xf32> to vector<4x256xf32>
    %137 = vector.shape_cast %134 : vector<4x256xf32> to vector<1x4x256xf32>
    tpu.vector_store %arg4[%c0_36, %c0_37, %c0_38], %137 {strides = array<i32>} : memref<2x4x256xf32, #tpu.memory_space<vmem>>, vector<1x4x256xf32>,
    %c1 = arith.constant 1 : index
    %c0_39 = arith.constant 0 : index
    %c0_40 = arith.constant 0 : index
    %138 = vector.load %arg1[%c1, %c0_39, %c0_40] : memref<2x4x256xf32, #tpu.memory_space<vmem>>, vector<1x4x256xf32>
    %139 = vector.shape_cast %138 : vector<1x4x256xf32> to vector<4x256xf32>
    %140 = tpu.concatenate %23, %139, %23 in 1 : vector<4x17xf32>, vector<4x256xf32>, vector<4x17xf32> -> vector<4x290xf32>
    %141 = vector.extract_strided_slice %140 {offsets = [0, 0], sizes = [4, 256], strides = [1, 1]} : vector<4x290xf32> to vector<4x256xf32>
    %cst_41 = arith.constant 0.000000e+00 : f32
    %142 = vector.shape_cast %18 : vector<1x256xi1> to vector<1x256xi1>
    %143 = vector.broadcast %142 : vector<1x256xi1> to vector<4x256xi1>
    %144 = vector.broadcast %cst_41 : f32 to vector<4x256xf32>
    %145 = arith.select %143, %141, %144 : vector<4x256xi1>, vector<4x256xf32>
    %146 = vector.extract_strided_slice %140 {offsets = [0, 1], sizes = [4, 256], strides = [1, 1]} : vector<4x290xf32> to vector<4x256xf32>
    %147 = vector.extract_strided_slice %140 {offsets = [0, 2], sizes = [4, 256], strides = [1, 1]} : vector<4x290xf32> to vector<4x256xf32>
    %cst_42 = arith.constant 0.000000e+00 : f32
    %148 = vector.shape_cast %20 : vector<1x256xi1> to vector<1x256xi1>
    %149 = vector.broadcast %148 : vector<1x256xi1> to vector<4x256xi1>
    %150 = vector.broadcast %cst_42 : f32 to vector<4x256xf32>
    %151 = arith.select %149, %147, %150 : vector<4x256xi1>, vector<4x256xf32>
    %152 = vector.extract_strided_slice %140 {offsets = [0, 16], sizes = [4, 256], strides = [1, 1]} : vector<4x290xf32> to vector<4x256xf32>
    %cst_43 = arith.constant 0.000000e+00 : f32
    %153 = vector.shape_cast %18 : vector<1x256xi1> to vector<1x256xi1>
    %154 = vector.broadcast %153 : vector<1x256xi1> to vector<4x256xi1>
    %155 = vector.broadcast %cst_43 : f32 to vector<4x256xf32>
    %156 = arith.select %154, %152, %155 : vector<4x256xi1>, vector<4x256xf32>
    %157 = vector.extract_strided_slice %140 {offsets = [0, 17], sizes = [4, 256], strides = [1, 1]} : vector<4x290xf32> to vector<4x256xf32>
    %158 = vector.extract_strided_slice %140 {offsets = [0, 18], sizes = [4, 256], strides = [1, 1]} : vector<4x290xf32> to vector<4x256xf32>
    %cst_44 = arith.constant 0.000000e+00 : f32
    %159 = vector.shape_cast %20 : vector<1x256xi1> to vector<1x256xi1>
    %160 = vector.broadcast %159 : vector<1x256xi1> to vector<4x256xi1>
    %161 = vector.broadcast %cst_44 : f32 to vector<4x256xf32>
    %162 = arith.select %160, %158, %161 : vector<4x256xi1>, vector<4x256xf32>
    %163 = vector.extract_strided_slice %140 {offsets = [0, 32], sizes = [4, 256], strides = [1, 1]} : vector<4x290xf32> to vector<4x256xf32>
    %cst_45 = arith.constant 0.000000e+00 : f32
    %164 = vector.shape_cast %18 : vector<1x256xi1> to vector<1x256xi1>
    %165 = vector.broadcast %164 : vector<1x256xi1> to vector<4x256xi1>
    %166 = vector.broadcast %cst_45 : f32 to vector<4x256xf32>
    %167 = arith.select %165, %163, %166 : vector<4x256xi1>, vector<4x256xf32>
    %168 = vector.extract_strided_slice %140 {offsets = [0, 33], sizes = [4, 256], strides = [1, 1]} : vector<4x290xf32> to vector<4x256xf32>
    %169 = vector.extract_strided_slice %140 {offsets = [0, 34], sizes = [4, 256], strides = [1, 1]} : vector<4x290xf32> to vector<4x256xf32>
    %cst_46 = arith.constant 0.000000e+00 : f32
    %170 = vector.shape_cast %20 : vector<1x256xi1> to vector<1x256xi1>
    %171 = vector.broadcast %170 : vector<1x256xi1> to vector<4x256xi1>
    %172 = vector.broadcast %cst_46 : f32 to vector<4x256xf32>
    %173 = arith.select %171, %169, %172 : vector<4x256xi1>, vector<4x256xf32>
    %174 = tpu.concatenate %145, %146, %151, %156, %157, %162, %167, %168, %173 in 0 : vector<4x256xf32>, vector<4x256xf32>, vector<4x256xf32>, vector<4x256xf32>, vector<4x256xf32>, vector<4x256xf32>, vector<4x256xf32>, vector<4x256xf32>, vector<4x256xf32> -> vector<36x256xf32>
    %cst_47 = arith.constant dense<0.000000e+00> : vector<4x256xf32>
    %175 = tpu.matmul %21, %174, %cst_47 {dimension_numbers = #tpu.dot_dimension_numbers<[1], [0], [0], [1], [0, 0, 1, 1], [], []>} : vector<4x36xf32>, vector<36x256xf32>, vector<4x256xf32> -> vector<4x256xf32>
    %cst_48 = arith.constant dense<0.000000e+00> : vector<4xf32>
    %176 = vector.multi_reduction <add>, %175, %cst_48 [1] : vector<4x256xf32> to vector<4xf32>
    %177 = vector.shape_cast %176 : vector<4xf32> to vector<4x1xf32>
    %cst_49 = arith.constant 2.560000e+02 : f32
    %178 = vector.broadcast %cst_49 : f32 to vector<4x1xf32>
    %179 = arith.divf %177, %178 : vector<4x1xf32>
    %180 = vector.broadcast %179 : vector<4x1xf32> to vector<4x256xf32>
    %181 = arith.subf %175, %180 : vector<4x256xf32>
    %182 = arith.mulf %181, %181 : vector<4x256xf32>
    %cst_50 = arith.constant dense<0.000000e+00> : vector<4xf32>
    %183 = vector.multi_reduction <add>, %182, %cst_50 [1] : vector<4x256xf32> to vector<4xf32>
    %184 = vector.shape_cast %183 : vector<4xf32> to vector<4x1xf32>
    %cst_51 = arith.constant 2.560000e+02 : f32
    %185 = vector.broadcast %cst_51 : f32 to vector<4x1xf32>
    %186 = arith.divf %184, %185 : vector<4x1xf32>
    %cst_52 = arith.constant 9.99999974E-6 : f32
    %187 = vector.broadcast %cst_52 : f32 to vector<4x1xf32>
    %188 = arith.addf %186, %187 : vector<4x1xf32>
    %189 = math.rsqrt %188 : vector<4x1xf32>
    %190 = vector.broadcast %189 : vector<4x1xf32> to vector<4x256xf32>
    %191 = arith.mulf %181, %190 : vector<4x256xf32>
    %cst_53 = arith.constant 0.000000e+00 : f32
    %192 = vector.broadcast %cst_53 : f32 to vector<4x256xf32>
    %193 = arith.maximumf %191, %192 : vector<4x256xf32>
    %194 = tpu.concatenate %23, %193, %23 in 1 : vector<4x17xf32>, vector<4x256xf32>, vector<4x17xf32> -> vector<4x290xf32>
    %195 = vector.extract_strided_slice %194 {offsets = [0, 0], sizes = [4, 256], strides = [1, 1]} : vector<4x290xf32> to vector<4x256xf32>
    %cst_54 = arith.constant 0.000000e+00 : f32
    %196 = vector.shape_cast %18 : vector<1x256xi1> to vector<1x256xi1>
    %197 = vector.broadcast %196 : vector<1x256xi1> to vector<4x256xi1>
    %198 = vector.broadcast %cst_54 : f32 to vector<4x256xf32>
    %199 = arith.select %197, %195, %198 : vector<4x256xi1>, vector<4x256xf32>
    %200 = vector.extract_strided_slice %194 {offsets = [0, 1], sizes = [4, 256], strides = [1, 1]} : vector<4x290xf32> to vector<4x256xf32>
    %201 = vector.extract_strided_slice %194 {offsets = [0, 2], sizes = [4, 256], strides = [1, 1]} : vector<4x290xf32> to vector<4x256xf32>
    %cst_55 = arith.constant 0.000000e+00 : f32
    %202 = vector.shape_cast %20 : vector<1x256xi1> to vector<1x256xi1>
    %203 = vector.broadcast %202 : vector<1x256xi1> to vector<4x256xi1>
    %204 = vector.broadcast %cst_55 : f32 to vector<4x256xf32>
    %205 = arith.select %203, %201, %204 : vector<4x256xi1>, vector<4x256xf32>
    %206 = vector.extract_strided_slice %194 {offsets = [0, 16], sizes = [4, 256], strides = [1, 1]} : vector<4x290xf32> to vector<4x256xf32>
    %cst_56 = arith.constant 0.000000e+00 : f32
    %207 = vector.shape_cast %18 : vector<1x256xi1> to vector<1x256xi1>
    %208 = vector.broadcast %207 : vector<1x256xi1> to vector<4x256xi1>
    %209 = vector.broadcast %cst_56 : f32 to vector<4x256xf32>
    %210 = arith.select %208, %206, %209 : vector<4x256xi1>, vector<4x256xf32>
    %211 = vector.extract_strided_slice %194 {offsets = [0, 17], sizes = [4, 256], strides = [1, 1]} : vector<4x290xf32> to vector<4x256xf32>
    %212 = vector.extract_strided_slice %194 {offsets = [0, 18], sizes = [4, 256], strides = [1, 1]} : vector<4x290xf32> to vector<4x256xf32>
    %cst_57 = arith.constant 0.000000e+00 : f32
    %213 = vector.shape_cast %20 : vector<1x256xi1> to vector<1x256xi1>
    %214 = vector.broadcast %213 : vector<1x256xi1> to vector<4x256xi1>
    %215 = vector.broadcast %cst_57 : f32 to vector<4x256xf32>
    %216 = arith.select %214, %212, %215 : vector<4x256xi1>, vector<4x256xf32>
    %217 = vector.extract_strided_slice %194 {offsets = [0, 32], sizes = [4, 256], strides = [1, 1]} : vector<4x290xf32> to vector<4x256xf32>
    %cst_58 = arith.constant 0.000000e+00 : f32
    %218 = vector.shape_cast %18 : vector<1x256xi1> to vector<1x256xi1>
    %219 = vector.broadcast %218 : vector<1x256xi1> to vector<4x256xi1>
    %220 = vector.broadcast %cst_58 : f32 to vector<4x256xf32>
    %221 = arith.select %219, %217, %220 : vector<4x256xi1>, vector<4x256xf32>
    %222 = vector.extract_strided_slice %194 {offsets = [0, 33], sizes = [4, 256], strides = [1, 1]} : vector<4x290xf32> to vector<4x256xf32>
    %223 = vector.extract_strided_slice %194 {offsets = [0, 34], sizes = [4, 256], strides = [1, 1]} : vector<4x290xf32> to vector<4x256xf32>
    %cst_59 = arith.constant 0.000000e+00 : f32
    %224 = vector.shape_cast %20 : vector<1x256xi1> to vector<1x256xi1>
    %225 = vector.broadcast %224 : vector<1x256xi1> to vector<4x256xi1>
    %226 = vector.broadcast %cst_59 : f32 to vector<4x256xf32>
    %227 = arith.select %225, %223, %226 : vector<4x256xi1>, vector<4x256xf32>
    %228 = tpu.concatenate %199, %200, %205, %210, %211, %216, %221, %222, %227 in 0 : vector<4x256xf32>, vector<4x256xf32>, vector<4x256xf32>, vector<4x256xf32>, vector<4x256xf32>, vector<4x256xf32>, vector<4x256xf32>, vector<4x256xf32>, vector<4x256xf32> -> vector<36x256xf32>
    %cst_60 = arith.constant dense<0.000000e+00> : vector<4x256xf32>
    %229 = tpu.matmul %22, %228, %cst_60 {dimension_numbers = #tpu.dot_dimension_numbers<[1], [0], [0], [1], [0, 0, 1, 1], [], []>} : vector<4x36xf32>, vector<36x256xf32>, vector<4x256xf32> -> vector<4x256xf32>
    %cst_61 = arith.constant dense<0.000000e+00> : vector<4xf32>
    %230 = vector.multi_reduction <add>, %229, %cst_61 [1] : vector<4x256xf32> to vector<4xf32>
    %231 = vector.shape_cast %230 : vector<4xf32> to vector<4x1xf32>
    %cst_62 = arith.constant 2.560000e+02 : f32
    %232 = vector.broadcast %cst_62 : f32 to vector<4x1xf32>
    %233 = arith.divf %231, %232 : vector<4x1xf32>
    %234 = vector.broadcast %233 : vector<4x1xf32> to vector<4x256xf32>
    %235 = arith.subf %229, %234 : vector<4x256xf32>
    %236 = arith.mulf %235, %235 : vector<4x256xf32>
    %cst_63 = arith.constant dense<0.000000e+00> : vector<4xf32>
    %237 = vector.multi_reduction <add>, %236, %cst_63 [1] : vector<4x256xf32> to vector<4xf32>
    %238 = vector.shape_cast %237 : vector<4xf32> to vector<4x1xf32>
    %cst_64 = arith.constant 2.560000e+02 : f32
    %239 = vector.broadcast %cst_64 : f32 to vector<4x1xf32>
    %240 = arith.divf %238, %239 : vector<4x1xf32>
    %cst_65 = arith.constant 9.99999974E-6 : f32
    %241 = vector.broadcast %cst_65 : f32 to vector<4x1xf32>
    %242 = arith.addf %240, %241 : vector<4x1xf32>
    %243 = math.rsqrt %242 : vector<4x1xf32>
    %244 = vector.broadcast %243 : vector<4x1xf32> to vector<4x256xf32>
    %245 = arith.mulf %235, %244 : vector<4x256xf32>
    %246 = arith.addf %245, %139 : vector<4x256xf32>
    %cst_66 = arith.constant 0.000000e+00 : f32
    %247 = vector.broadcast %cst_66 : f32 to vector<4x256xf32>
    %248 = arith.maximumf %246, %247 : vector<4x256xf32>
    %c1_67 = arith.constant 1 : index
    %c0_68 = arith.constant 0 : index
    %c0_69 = arith.constant 0 : index
    %249 = vector.load %arg4[%c1_67, %c0_68, %c0_69] : memref<2x4x256xf32, #tpu.memory_space<vmem>>, vector<1x4x256xf32>
    %250 = vector.shape_cast %249 : vector<1x4x256xf32> to vector<4x256xf32>
    %251 = vector.shape_cast %248 : vector<4x256xf32> to vector<1x4x256xf32>
    tpu.vector_store %arg4[%c1_67, %c0_68, %c0_69], %251 {strides = array<i32>} : memref<2x4x256xf32, #tpu.memory_space<vmem>>, vector<1x4x256xf32>,
    return
  }
  func.func @transform_0(%arg0: i32) -> (i32, i32, i32) {
    %c0_i32 = arith.constant 0 : i32
    %c0_i32_0 = arith.constant 0 : i32
    %c0_i32_1 = arith.constant 0 : i32
    return %arg0, %c0_i32, %c0_i32_0 : i32, i32, i32
  }
  func.func @transform_1(%arg0: i32) -> (i32, i32) {
    %c0_i32 = arith.constant 0 : i32
    %c0_i32_0 = arith.constant 0 : i32
    %c0_i32_1 = arith.constant 0 : i32
    return %c0_i32, %c0_i32_0 : i32, i32
  }
  func.func @transform_2(%arg0: i32) -> (i32, i32) {
    %c0_i32 = arith.constant 0 : i32
    %c0_i32_0 = arith.constant 0 : i32
    %c0_i32_1 = arith.constant 0 : i32
    return %c0_i32, %c0_i32_0 : i32, i32
  }
  func.func @transform_3(%arg0: i32) -> (i32, i32, i32) {
    %c0_i32 = arith.constant 0 : i32
    %c0_i32_0 = arith.constant 0 : i32
    %c0_i32_1 = arith.constant 0 : i32
    return %arg0, %c0_i32, %c0_i32_0 : i32, i32, i32
  }
}

</mosaic_0001>

<bundles_post_ra>
// kernel: tpu_custom_call.1
= control target key start
LH: loop header
LB: loop body
LE: loop exit
PB: predicated region body
PF: predicated region fallthrough
CT: control target
= control target key end

     0   :  { %8 = vsyncpa [#allocation3], 0  ;;  %s1964_s0 = inlined_call_operand.hbm [shape: f32[2,4,256], index: 0, kind: input, shape index: {}]   ;;  %s1965_s1 = inlined_call_operand.hbm [shape: f32[4,36], index: 1, kind: input, shape index: {}]   ;;  %s1966_s2 = inlined_call_operand.vmem [shape: f32[4,36], index: 2, kind: input, shape index: {}]   ;;  %s1967_s3 = inlined_call_operand.hbm [shape: f32[2,4,256], index: 3, kind: output, shape index: {}]  }
   0x1   :  { %9 = vsyncpa [#allocation6], 0 }
   0x2   :  { %10 = vsyncpa [#allocation4], 0  ;;  %s1393_s12 = smov [#allocation2]   ;;  %s1321_s16 = scalar_lea.hbm %s1964_s0, 256 }
   0x3   :  { %s16_s13 = sshll.u32 %s1393_s12, 4  ;;  %p1322_p0 = scmp.ne.s32.totalorder %s1964_s0, %s1321_s16  ;;  %s17_s13 = int_to_ptr.vmem [resolvable:$true] %s16_s13 }
   0x4   :  { %p1325_p1 = scmp.lt.u32.totalorder %s1321_s16, %s1964_s0 }
   0x6   :  { %p1327_p2 = pnand %p1325_p1, %p1322_p0 }
   0x8   :  { %1330 = shalt.err (!%p1327_p2)
}
   0x9   :  { %s1331_s21 = scalar_lea.vmem %s17_s13, 256  ;;  %p1336_p4 = scmp.lt.s32.totalorder %s17_s13, %s17_s13 }
   0xa   :  { %p1332_p3 = scmp.ne.s32.totalorder %s17_s13, %s1331_s21  ;;  %p1337_p5 = scmp.lt.s32.totalorder %s1331_s21, %s1331_s21 }
   0xc   :  { %p1338_p6 = por %p1337_p5, %p1336_p4 }
   0xe   :  { %p1339_p7 = pnand %p1338_p6, %p1332_p3 }
  0x10   :  { %1342 = shalt.err (!%p1339_p7)
}
  0x11   :  { %s1394_s22 = smov 128   ;;  %s1395_s23 = smov 8  }
  0x12   :  { %22 = dma.hbm_to_vmem [thread:$0]  %s1964_s0, 256, %s17_s13, [#allocation3], %s1394_s22, %s1394_s22, %s1395_s23  }
  0x13   :  { %s1396_s26 = smov [#allocation5]   ;;  %s1343_s30 = scalar_lea.hbm %s1965_s1, 64 }
  0x14   :  { %s29_s27 = sshll.u32 %s1396_s26, 4  ;;  %p1344_p8 = scmp.ne.s32.totalorder %s1965_s1, %s1343_s30  ;;  %s30_s27 = int_to_ptr.vmem [resolvable:$true] %s29_s27 }
  0x15   :  { %p1347_p9 = scmp.lt.u32.totalorder %s1343_s30, %s1965_s1 }
  0x17   :  { %p1349_p10 = pnand %p1347_p9, %p1344_p8 }
  0x19   :  { %1352 = shalt.err (!%p1349_p10)
}
  0x1a   :  { %s1353_s8 = scalar_lea.vmem %s30_s27, 64  ;;  %p1358_p12 = scmp.lt.s32.totalorder %s30_s27, %s30_s27 }
  0x1b   :  { %p1354_p11 = scmp.ne.s32.totalorder %s30_s27, %s1353_s8  ;;  %p1359_p13 = scmp.lt.s32.totalorder %s1353_s8, %s1353_s8 }
  0x1d   :  { %p1360_p0 = por %p1359_p13, %p1358_p12 }
  0x1f   :  { %p1361_p1 = pnand %p1360_p0, %p1354_p11 }
  0x21   :  { %1364 = shalt.err (!%p1361_p1)
}
  0x22   :  { %32 = dma.hbm_to_vmem [thread:$0]  %s1965_s1, 64, %s30_s27, [#allocation6]  }
  0x23   :  { %1387 = dma.done.wait [#allocation3], 256  }
  0x24   :  { %1388 = vsyncadd [#allocation3], 4294967040 }
  0x25   :  { %1389 = dma.done.wait [#allocation6], 64  }
  0x26   :  { %1390 = vsyncadd [#allocation6], 4294967232  ;;  %v566_v0 = vld [vmem:[#allocation2 + $0x8] sm:$0xff]  ;;  %v74_v1 = vld [vmem:[#allocation2] sm:$0xff]  ;;  %s1397_s10 = smov 17   ;;  %vm81_vm0 = vcmask 138240   ;;  %v41_v32 = vlaneseq }
  0x27   :  { %569 = vrot.lane.b32.xlu1 %v566_v0, %s1397_s10  ;;  %77 = vrot.lane.b32.xlu0 %v74_v1, %s1397_s10  ;;  %v1457_v2 = vcombine.high %v566_v0, %v566_v0  ;;  %v1459_v3 = vcombine.high %v74_v1, %v74_v1  ;;  %s1398_s1 = smov 112   ;;  %s1399_s11 = smov 126   ;;  %v1406_v25 = vmov 0.0   ;;  %vm119_vm2 = vcmask 916480  }
  0x28   :  { %s1400_s12 = smov 110   ;;  %s1401_s13 = smov 96   ;;  %296 = vmatprep.mubr.f32.mxu0 %v1406_v25  ;;  %528 = vmatprep.mubr.f32.mxu1 %v1406_v25  ;;  %v42_v33 = vand.u32 127, %v41_v32  ;;  %vm106_vm3 = vcmask 1031168   ;;  %vm132_vm5 = vcmask 900096   ;;  %vm145_vm7 = vcmask 785408  }
  0x29   :  { %s1402_s14 = smov 111   ;;  %s1403_s15 = smov 95   ;;  %vm191_vm9 = vcmask 908288   ;;  %vm213_vm10 = vcmask 1043456   ;;  %vm208_vm11 = vcmask 777216   ;;  %vm174_vm12 = vcmask 1039360  }
  0x2a   :  { %s1404_s16 = smov 94   ;;  %s1405_s17 = smov 127   ;;  %v43_v36 = vadd.s32 128, %v42_v33  ;;  %v48_v37 = vand.u32 15, %v42_v33  ;;  %vm158_vm13 = vcmask 769024   ;;  %vm222_vm14 = vcmask 293888  }
  0x2b   :  { %571 = vrot.lane.b32.xlu1 %v1457_v2, %s1397_s10  ;;  %79 = vrot.lane.b32.xlu0 %v1459_v3, %s1397_s10 }
  0x2c   :  { %v55_v40 = vand.u32 15, %v43_v36  ;;  %vm1535_vm1 = vcmp.ge.s32.totalorder %v48_v37, 1  ;;  %vm1559_vm8 = vcmp.lt.s32.totalorder %v48_v37, 15 }
  0x2e   :  { %vm1540_vm4 = vcmp.lt.s32.totalorder %v55_v40, 15  ;;  %vm1544_vm6 = vcmp.ge.s32.totalorder %v55_v40, 1 }
  0x99   :  { %v570_v4 = vpop.permute.xlu1 %569  ;;  %v78_v5 = vpop.permute.xlu0 %77 }
  0x9a   :  { %v1466_v8 = vsel %vm81_vm0, 0.0, %v78_v5  ;;  %v1487_v14 = vsel %vm81_vm0, 0.0, %v570_v4 }
  0x9b   :  { %v165_v16 = vrot.slane %v1466_v8, 4  ;;  %v643_v23 = vrot.slane %v1487_v14, 4  ;;  %v92_v53 = vsel %vm1535_vm1, %v1466_v8, 0.0  ;;  %v579_v58 = vsel %vm1535_vm1, %v1487_v14, 0.0 }
  0x9d   :  { %v572_v6 = vpop.permute.xlu1 %571  ;;  %v80_v7 = vpop.permute.xlu0 %79 }
  0x9e   :  { %v1469_v9 = vsel %vm81_vm0, %v570_v4, %v572_v6  ;;  %v1472_v10 = vsel %vm81_vm0, %v78_v5, %v80_v7  ;;  %v87_v11 = vsel %vm81_vm0, %v80_v7, 0.0  ;;  %v578_v15 = vsel %vm81_vm0, %v572_v6, 0.0 }
  0x9f   :  { %v1114_v12 = vpack.i.bf16 %v1469_v9, %v1466_v8  ;;  %v1109_v13 = vpack.i.bf16 %v87_v11, %v1472_v10  ;;  %v1159_v17 = vpack.i.bf16 %v1487_v14, %v578_v15  ;;  %v166_v18 = vrot.slane %v1472_v10, 4 }
  0xa0   :  { %v167_v19 = vrot.slane %v87_v11, 4  ;;  %v644_v21 = vrot.slane %v1469_v9, 4  ;;  %v645_v24 = vrot.slane %v578_v15, 4  ;;  %v93_v0 = vsel %vm1544_vm6, %v1472_v10, 0.0 }
  0xa1   :  { %1115 = vrot.lane.b32.xlu1 %v1114_v12, %s1398_s1  ;;  %1110 = vrot.lane.b32.xlu0 %v1109_v13, %s1398_s1  ;;  %v580_v6 = vsel %vm1544_vm6, %v1469_v9, 0.0 }
  0xa2   :  { %v1169_v20 = vpack.i.bf16 %v167_v19, %v166_v18  ;;  %v1174_v22 = vpack.i.bf16 %v644_v21, %v165_v16  ;;  %v1194_v26 = vpack.i.bf16 %v643_v23, %v645_v24  ;;  %v1204_v27 = vpack.i.bf16 %v645_v24, %v644_v21 }
  0xa5   :  { %1125 = vrot.lane.b32.xlu1 %v1114_v12, %s1399_s11  ;;  %1120 = vrot.lane.b32.xlu0 %v1109_v13, %s1399_s11 }
  0xa9   :  { %1130 = vrot.lane.b32.xlu1 %v1109_v13, %s1400_s12  ;;  %1140 = vrot.lane.b32.xlu0 %v1109_v13, %s1401_s13 }
  0xad   :  { %1135 = vrot.lane.b32.xlu1 %v1114_v12, %s1400_s12  ;;  %1150 = vrot.lane.b32.xlu0 %v1109_v13, %s1402_s14 }
  0xb1   :  { %1145 = vrot.lane.b32.xlu1 %v1114_v12, %s1401_s13  ;;  %1155 = vrot.lane.b32.xlu0 %v1114_v12, %s1402_s14 }
  0xb5   :  { %202 = vrot.lane.b32.xlu1 %v165_v16, %s1403_s15  ;;  %1160 = vrot.lane.b32.xlu0 %v1159_v17, %s1398_s1 }
  0xb9   :  { %1165 = vrot.lane.b32.xlu1 %v1159_v17, %s1399_s11  ;;  %154 = vrot.lane.b32.xlu0 %v1472_v10, %s1404_s16 }
  0xbd   :  { %156 = vrot.lane.b32.xlu1 %v87_v11, %s1404_s16  ;;  %1170 = vrot.lane.b32.xlu0 %v1169_v20, %s1405_s17 }
  0xc1   :  { %1180 = vrot.lane.b32.xlu1 %v1169_v20, %s1403_s15  ;;  %1175 = vrot.lane.b32.xlu0 %v1174_v22, %s1405_s17 }
  0xc5   :  { %152 = vrot.lane.b32.xlu1 %v1466_v8, %s1404_s16  ;;  %1185 = vrot.lane.b32.xlu0 %v1159_v17, %s1400_s12 }
  0xc9   :  { %1190 = vrot.lane.b32.xlu1 %v1159_v17, %s1401_s13  ;;  %1195 = vrot.lane.b32.xlu0 %v1194_v26, %s1405_s17 }
  0xcd   :  { %1205 = vrot.lane.b32.xlu1 %v1204_v27, %s1403_s15  ;;  %1200 = vrot.lane.b32.xlu0 %v1159_v17, %s1402_s14 }
  0xd1   :  { %633 = vrot.lane.b32.xlu1 %v1469_v9, %s1404_s16  ;;  %678 = vrot.lane.b32.xlu0 %v643_v23, %s1403_s15 }
  0xd5   :  { %631 = vrot.lane.b32.xlu1 %v1487_v14, %s1404_s16  ;;  %635 = vrot.lane.b32.xlu0 %v578_v15, %s1404_s16 }
 0x113   :  { %v1521_v28 = vpop.permute.xlu1 %1115  ;;  %v1111_v29 = vpop.permute.xlu0 %1110 }
 0x114   :  { %v1113_v41 = vunpack.i.h.bf16 %v1111_v29  ;;  %v1112_v42 = vunpack.i.l.bf16 %v1111_v29  ;;  %v1117_v46 = vunpack.i.l.bf16 %v1521_v28  ;;  %v1118_v19 = vunpack.i.h.bf16 %v1521_v28 }
 0x116   :  { %v121_v54 = vsel %vm119_vm2, %v1112_v42, %v1113_v41  ;;  %v120_v59 = vsel %vm119_vm2, %v1117_v46, %v1112_v42 }
 0x117   :  { %v1523_v30 = vpop.permute.xlu1 %1125  ;;  %v1121_v31 = vpop.permute.xlu0 %1120  ;;  %v125_v5 = vsel %vm1544_vm6, %v121_v54, 0.0  ;;  %v124_v13 = vsel %vm1535_vm1, %v120_v59, 0.0 }
 0x118   :  { %v1123_v47 = vunpack.i.h.bf16 %v1121_v31  ;;  %v1122_v48 = vunpack.i.l.bf16 %v1121_v31  ;;  %v1127_v55 = vunpack.i.l.bf16 %v1523_v30  ;;  %v1128_v20 = vunpack.i.h.bf16 %v1523_v30 }
 0x119   :  { %v182_v21 = vrot.slane %v125_v5, 4  ;;  %v181_v26 = vrot.slane %v124_v13, 4 }
 0x11a   :  { %v108_v62 = vsel %vm106_vm3, %v1122_v48, %v1123_v47  ;;  %v107_v10 = vsel %vm106_vm3, %v1127_v55, %v1122_v48 }
 0x11b   :  { %v1131_v34 = vpop.permute.xlu1 %1130  ;;  %v1525_v35 = vpop.permute.xlu0 %1140  ;;  %v112_v12 = vsel %vm1540_vm4, %v108_v62, 0.0  ;;  %v111_v24 = vsel %vm1559_vm8, %v107_v10, 0.0 }
 0x11c   :  { %v1133_v49 = vunpack.i.h.bf16 %v1131_v34  ;;  %v1132_v50 = vunpack.i.l.bf16 %v1131_v34  ;;  %v1143_v1 = vunpack.i.h.bf16 %v1525_v35  ;;  %v1142_v4 = vunpack.i.l.bf16 %v1525_v35 }
 0x11d   :  { %v217_v28 = vsel %vm213_vm10, %v112_v12, %v182_v21  ;;  %v216_v40 = vsel %vm213_vm10, %v111_v24, %v181_v26 }
 0x11e   :  { %v134_v63 = vsel %vm132_vm5, %v1132_v50, %v1133_v49  ;;  %v147_v22 = vsel %vm145_vm7, %v1142_v4, %v1143_v1 }
 0x11f   :  { %v1527_v38 = vpop.permute.xlu1 %1135  ;;  %v1529_v39 = vpop.permute.xlu0 %1150  ;;  %v138_v15 = vsel %vm1540_vm4, %v134_v63, 0.0  ;;  %v151_v41 = vsel %vm1544_vm6, %v147_v22, 0.0 }
 0x120   :  { %v1137_v61 = vunpack.i.l.bf16 %v1527_v38  ;;  %v1153_v17 = vunpack.i.h.bf16 %v1529_v39  ;;  %v1152_v18 = vunpack.i.l.bf16 %v1529_v39  ;;  %v199_v27 = vrot.slane %v138_v15, 4 }
 0x121   :  { %v1138_v42 = vunpack.i.h.bf16 %v1527_v38 }
 0x122   :  { %v133_v16 = vsel %vm132_vm5, %v1137_v61, %v1132_v50  ;;  %v193_v30 = vsel %vm191_vm9, %v1152_v18, %v1153_v17 }
 0x123   :  { %v1531_v43 = vpop.permute.xlu1 %1145  ;;  %v1533_v44 = vpop.permute.xlu0 %1155  ;;  %v137_v29 = vsel %vm1559_vm8, %v133_v16, 0.0  ;;  %v219_v59 = vsel %vm213_vm10, %v193_v30, %v199_v27 }
 0x124   :  { %v1147_v23 = vunpack.i.l.bf16 %v1531_v43  ;;  %v1157_v37 = vunpack.i.l.bf16 %v1533_v44  ;;  %v198_v46 = vrot.slane %v137_v29, 4 }
 0x126   :  { %v146_v47 = vsel %vm145_vm7, %v1147_v23, %v1142_v4  ;;  %v192_v38 = vsel %vm191_vm9, %v1157_v37, %v1152_v18 }
 0x127   :  { %v1553_v56 = vpop.permute.xlu1 %202  ;;  %v1161_v57 = vpop.permute.xlu0 %1160  ;;  %v150_v12 = vsel %vm1535_vm1, %v146_v47, 0.0 }
 0x128   :  { %v1162_v31 = vunpack.i.l.bf16 %v1161_v57  ;;  %v1163_v34 = vunpack.i.h.bf16 %v1161_v57 }
 0x12a   :  { %v602_v49 = vsel %vm119_vm2, %v1118_v19, %v1162_v31  ;;  %v601_v61 = vsel %vm119_vm2, %v1163_v34, %v1118_v19  ;;  %v1158_v31 = vunpack.i.h.bf16 %v1533_v44 }
 0x12b   :  { %v1166_v7 = vpop.permute.xlu1 %1165  ;;  %v1576_v11 = vpop.permute.xlu0 %154  ;;  %v605_v15 = vsel %vm1535_vm1, %v601_v61, 0.0 }
 0x12c   :  { %v1167_v39 = vunpack.i.l.bf16 %v1166_v7  ;;  %v1168_v50 = vunpack.i.h.bf16 %v1166_v7  ;;  %v606_v7 = vsel %vm1544_vm6, %v602_v49, 0.0  ;;  %v658_v8 = vrot.slane %v605_v15, 4 }
 0x12d   :  { %v659_v26 = vrot.slane %v606_v7, 4 }
 0x12e   :  { %v590_v4 = vsel %vm106_vm3, %v1128_v20, %v1167_v39  ;;  %v589_v16 = vsel %vm106_vm3, %v1168_v50, %v1128_v20  ;;  %v1148_v20 = vunpack.i.h.bf16 %v1531_v43 }
 0x12f   :  { %v157_v32 = vpop.permute.xlu1 %156  ;;  %v1171_v33 = vpop.permute.xlu0 %1170  ;;  %v594_v24 = vsel %vm1540_vm4, %v590_v4, 0.0  ;;  %v72_v4 = vld [vmem:[#allocation5] sm:$0xf] }
 0x130   :  { %v1173_v35 = vunpack.i.h.bf16 %v1171_v33  ;;  %v1172_v36 = vunpack.i.l.bf16 %v1171_v33  ;;  %v218_v33 = vsel %vm213_vm10, %v192_v38, %v198_v46  ;;  %v160_v30 = vsel %vm158_vm13, %v1576_v11, %v157_v32 }
 0x131   :  { %v691_v44 = vsel %vm213_vm10, %v594_v24, %v659_v26  ;;  %v164_v32 = vsel %vm1540_vm4, %v160_v30, 0.0 }
 0x132   :  { %v176_v48 = vsel %vm174_vm12, %v1172_v36, %v1173_v35 }
 0x133   :  { %v1181_v54 = vpop.permute.xlu1 %1180  ;;  %v1176_v55 = vpop.permute.xlu0 %1175  ;;  %v215_v57 = vsel %vm213_vm10, %v93_v0, %v176_v48 }
 0x134   :  { %v1183_v62 = vunpack.i.h.bf16 %v1181_v54  ;;  %v1182_v63 = vunpack.i.l.bf16 %v1181_v54  ;;  %v1177_v1 = vunpack.i.l.bf16 %v1176_v55  ;;  %v1062_v5 = vpack.c.bf16 %v217_v28, %v215_v57 }
 0x135   :  { %v593_v28 = vsel %vm1559_vm8, %v589_v16, 0.0 }
 0x136   :  { %v209_v0 = vsel %vm208_vm11, %v1553_v56, %v1182_v63  ;;  %v210_v10 = vsel %vm208_vm11, %v1182_v63, %v1183_v62  ;;  %v175_v13 = vsel %vm174_vm12, %v1177_v1, %v1172_v36  ;;  %1063 = vmatprep.subr.bf16.mxu0 %v1062_v5 }
 0x137   :  { %v153_v17 = vpop.permute.xlu1 %152  ;;  %v1186_v18 = vpop.permute.xlu0 %1185  ;;  %v214_v19 = vsel %vm213_vm10, %v92_v53, %v175_v13  ;;  %v221_v56 = vsel %vm213_vm10, %v151_v41, %v210_v10  ;;  %v220_v29 = vsel %vm213_vm10, %v150_v12, %v209_v0  ;;  %v1178_v41 = vunpack.i.h.bf16 %v1176_v55 }
 0x138   :  { %v1188_v21 = vunpack.i.h.bf16 %v1186_v18  ;;  %v1187_v22 = vunpack.i.l.bf16 %v1186_v18  ;;  %v1064_v23 = vpack.c.bf16 %v216_v40, %v214_v19  ;;  %v1066_v27 = vpack.c.bf16 %v221_v56, %v219_v59 }
 0x139   :  { %v159_v43 = vsel %vm158_vm13, %v153_v17, %v1576_v11  ;;  %v1068_v40 = vpack.c.bf16 %v220_v29, %v218_v33 }
 0x13a   :  { %v614_v53 = vsel %vm132_vm5, %v1138_v42, %v1187_v22  ;;  %1065 = vmatpush1.bf16.msra.mxu0 %v1064_v23  ;;  %v613_v36 = vsel %vm132_vm5, %v1188_v21, %v1138_v42  ;;  %v163_v11 = vsel %vm1559_vm8, %v159_v43, 0.0  ;;  %v690_v42 = vsel %vm213_vm10, %v593_v28, %v658_v8 }
 0x13b   :  { %v1191_v34 = vpop.permute.xlu1 %1190  ;;  %v1196_v35 = vpop.permute.xlu0 %1195  ;;  %1067 = vmatprep.subr.bf16.mxu0 %v1066_v27  ;;  %v618_v37 = vsel %vm1540_vm4, %v614_v53, 0.0  ;;  %v617_v50 = vsel %vm1559_vm8, %v613_v36, 0.0 }
 0x13c   :  { %v1192_v39 = vunpack.i.l.bf16 %v1191_v34  ;;  %v1193_v46 = vunpack.i.h.bf16 %v1191_v34  ;;  %v1198_v47 = vunpack.i.h.bf16 %v1196_v35  ;;  %v1197_v48 = vunpack.i.l.bf16 %v1196_v35 }
 0x13d   :  { %v675_v54 = vrot.slane %v618_v37, 4  ;;  %v674_v16 = vrot.slane %v617_v50, 4 }
 0x13e   :  { %v626_v49 = vsel %vm145_vm7, %v1148_v20, %v1192_v39  ;;  %1069 = vmatpush1.bf16.msra.mxu0 %v1068_v40  ;;  %v652_v55 = vsel %vm174_vm12, %v1198_v47, %v1178_v41  ;;  %v653_v57 = vsel %vm174_vm12, %v1178_v41, %v1197_v48  ;;  %v625_v5 = vsel %vm145_vm7, %v1193_v46, %v1148_v20 }
 0x13f   :  { %v1206_v59 = vpop.permute.xlu1 %1205  ;;  %v1201_v61 = vpop.permute.xlu0 %1200  ;;  %1050 = vmatprep.subr.msk.mxu0 %vm213_vm10, %v164_v32  ;;  %v689_v12 = vsel %vm213_vm10, %v580_v6, %v653_v57  ;;  %v688_v7 = vsel %vm213_vm10, %v579_v58, %v652_v55  ;;  %v630_v0 = vsel %vm1544_vm6, %v626_v49, 0.0  ;;  %v629_v19 = vsel %vm1535_vm1, %v625_v5, 0.0 }
 0x140   :  { %v1208_v62 = vunpack.i.h.bf16 %v1206_v59  ;;  %v1207_v63 = vunpack.i.l.bf16 %v1206_v59  ;;  %v1203_v1 = vunpack.i.h.bf16 %v1201_v61  ;;  %v1202_v38 = vunpack.i.l.bf16 %v1201_v61 }
 0x141   :  { %v1078_v9 = vpack.c.bf16 %v691_v44, %v689_v12  ;;  %v1080_v14 = vpack.c.bf16 %v690_v42, %v688_v7 }
 0x142   :  { %v685_v10 = vsel %vm208_vm11, %v1207_v63, %v1208_v62  ;;  %v668_v13 = vsel %vm191_vm9, %v1203_v1, %v1158_v31  ;;  %v669_v15 = vsel %vm191_vm9, %v1158_v31, %v1202_v38  ;;  %1051 = vmatpush1.msk.msra.mxu0 %vm213_vm10, %v163_v11 }
 0x143   :  { %v634_v6 = vpop.permute.xlu1 %633  ;;  %v679_v17 = vpop.permute.xlu0 %678  ;;  %1052 = vmatmul.mubr.msk.f32.vlgmr.msra.gmra.mrb[0].mxu0 %vm222_vm14, %v72_v4  ;;  %v693_v58 = vsel %vm213_vm10, %v669_v15, %v675_v54  ;;  %v695_v18 = vsel %vm213_vm10, %v630_v0, %v685_v10  ;;  %1079 = vmatprep.subr.bf16.mxu0 %v1078_v9  ;;  %v692_v22 = vsel %vm213_vm10, %v668_v13, %v674_v16 }
 0x144   :  { %v684_v56 = vsel %vm208_vm11, %v679_v17, %v1207_v63  ;;  %v1082_v21 = vpack.c.bf16 %v695_v18, %v693_v58  ;;  %766 = vmatprep.mubr.f32.mxu0 %v1406_v25  ;;  %1081 = vmatpush1.bf16.msra.mxu0 %v1080_v14 }
 0x145   :  { %v694_v23 = vsel %vm213_vm10, %v629_v19, %v684_v56 }
 0x146   :  { %v1084_v24 = vpack.c.bf16 %v694_v23, %v692_v22  ;;  %1083 = vmatprep.subr.bf16.mxu0 %v1082_v21 }
 0x147   :  { %v632_v20 = vpop.permute.xlu1 %631  ;;  %v636_v26 = vpop.permute.xlu0 %635 }
 0x148   :  { %v638_v27 = vsel %vm158_vm13, %v634_v6, %v636_v26  ;;  %v637_v29 = vsel %vm158_vm13, %v632_v20, %v634_v6  ;;  %1085 = vmatpush1.bf16.msra.mxu0 %v1084_v24 }
 0x149   :  { %v642_v31 = vsel %vm1540_vm4, %v638_v27, 0.0  ;;  %v641_v8 = vsel %vm1559_vm8, %v637_v29, 0.0 }
 0x14a   :  { %1056 = vmatprep.subr.msk.mxu0 %vm213_vm10, %v642_v31 }
 0x14c   :  { %1057 = vmatpush1.msk.msra.mxu0 %vm213_vm10, %v641_v8 }
 0x14d   :  { %1058 = vmatmul.mubr.msk.f32.vlgmr.msra.gmra.mrb[2].mxu0 %vm222_vm14, %v72_v4 }
 0x216   :  { %v298_v53 = vpop.f32.mrb[0].mxu0 }
 0x217   :  { %v303_v33 = vsel %vm213_vm10, %v298_v53, 0.0  ;;  %v300_v28 = vpop.f32.mrb[1].mxu0 }
 0x218   :  { %v304_v30 = vsel %vm213_vm10, %v300_v28, 0.0 }
 0x219   :  { %v305_v43 = vadd.f32 %v304_v30, %v303_v33 }
 0x21b   :  { %306 = vadd.xlane.f32.xlu0 %v305_v43 }
 0x220   :  { %v768_v34 = vpop.f32.mrb[2].mxu0 }
 0x221   :  { %v773_v35 = vsel %vm213_vm10, %v768_v34, 0.0  ;;  %v770_v44 = vpop.f32.mrb[3].mxu0 }
 0x222   :  { %v774_v36 = vsel %vm213_vm10, %v770_v44, 0.0 }
 0x223   :  { %v775_v37 = vadd.f32 %v774_v36, %v773_v35 }
 0x225   :  { %776 = vadd.xlane.f32.xlu1 %v775_v37 }
 0x2a8   :  { %v307_v39 = vpop.xlane.xlu0 %306 }
 0x2a9   :  { %v309_v40 = vmul.f32 0.00390625, %v307_v39 }
 0x2ab   :  { %v310_v41 = vsub.f32 %v298_v53, %v309_v40  ;;  %v311_v46 = vsub.f32 %v300_v28, %v309_v40 }
 0x2ad   :  { %v312_v47 = vmul.f32 %v310_v41, %v310_v41  ;;  %v313_v48 = vmul.f32 %v311_v46, %v311_v46 }
 0x2af   :  { %v314_v32 = vsel %vm213_vm10, %v312_v47, 0.0  ;;  %v315_v11 = vsel %vm213_vm10, %v313_v48, 0.0 }
 0x2b0   :  { %v316_v49 = vadd.f32 %v315_v11, %v314_v32 }
 0x2b2   :  { %317 = vadd.xlane.f32.xlu0 %v316_v49  ;;  %v777_v42 = vpop.xlane.xlu1 %776 }
 0x2b3   :  { %v778_v50 = vmul.f32 0.00390625, %v777_v42 }
 0x2b5   :  { %v779_v54 = vsub.f32 %v768_v34, %v778_v50  ;;  %v780_v55 = vsub.f32 %v770_v44, %v778_v50 }
 0x2b7   :  { %v781_v57 = vmul.f32 %v779_v54, %v779_v54  ;;  %v782_v59 = vmul.f32 %v780_v55, %v780_v55 }
 0x2b9   :  { %v783_v61 = vsel %vm213_vm10, %v781_v57, 0.0  ;;  %v784_v62 = vsel %vm213_vm10, %v782_v59, 0.0 }
 0x2ba   :  { %v785_v63 = vadd.f32 %v784_v62, %v783_v61 }
 0x2bc   :  { %786 = vadd.xlane.f32.xlu0 %v785_v63 }
 0x33f   :  { %v318_v1 = vpop.xlane.xlu0 %317 }
 0x340   :  { %v319_v38 = vmul.f32 0.00390625, %v318_v1 }
 0x342   :  { %v320_v4 = vadd.f32 1e-05, %v319_v38 }
 0x344   :  { %1311 = vrsqrt.f32 %v320_v4 }
 0x349   :  { %v787_v5 = vpop.xlane.xlu0 %786 }
 0x34a   :  { %v788_v12 = vmul.f32 0.00390625, %v787_v5 }
 0x34c   :  { %v789_v7 = vadd.f32 1e-05, %v788_v12 }
 0x34e   :  { %v1312_v0 = vpop.eup %1311  ;;  %1313 = vrsqrt.f32 %v789_v7 }
 0x34f   :  { %v323_v10 = vmul.f32 %v1312_v0, %v311_v46  ;;  %v322_v13 = vmul.f32 %v1312_v0, %v310_v41 }
 0x351   :  { %v325_v15 = vmax.f32 %v323_v10, 0.0  ;;  %v324_v9 = vmax.f32 %v322_v13, 0.0 }
 0x353   :  { %330 = vrot.lane.b32.xlu0 %v325_v15, %s1397_s10  ;;  %328 = vrot.lane.b32.xlu1 %v324_v9, %s1397_s10 }
 0x358   :  { %v1314_v16 = vpop.eup %1313 }
 0x359   :  { %v791_v6 = vmul.f32 %v1314_v16, %v779_v54  ;;  %v792_v14 = vmul.f32 %v1314_v16, %v780_v55 }
 0x35b   :  { %v793_v17 = vmax.f32 %v791_v6, 0.0  ;;  %v794_v58 = vmax.f32 %v792_v14, 0.0 }
 0x35d   :  { %797 = vrot.lane.b32.xlu1 %v793_v17, %s1397_s10 }
 0x361   :  { %799 = vrot.lane.b32.xlu1 %v794_v58, %s1397_s10 }
 0x3c5   :  { %v329_v18 = vpop.permute.xlu1 %328  ;;  %v331_v19 = vpop.permute.xlu0 %330 }
 0x3c6   :  { %v1704_v56 = vsel %vm81_vm0, %v329_v18, %v331_v19  ;;  %v337_v21 = vsel %vm81_vm0, %v331_v19, 0.0  ;;  %v1714_v20 = vsel %vm81_vm0, 0.0, %v329_v18 }
 0x3c7   :  { %v1219_v22 = vpack.i.bf16 %v337_v21, %v1704_v56  ;;  %v403_v23 = vrot.slane %v1704_v56, 4  ;;  %v404_v24 = vrot.slane %v337_v21, 4  ;;  %v402_v31 = vrot.slane %v1714_v20, 4 }
 0x3c8   :  { %v339_v14 = vsel %vm1544_vm6, %v1704_v56, 0.0 }
 0x3c9   :  { %1220 = vrot.lane.b32.xlu1 %v1219_v22, %s1400_s12  ;;  %1210 = vrot.lane.b32.xlu0 %v1219_v22, %s1398_s1  ;;  %v1239_v27 = vpack.i.bf16 %v404_v24, %v403_v23 }
 0x3cd   :  { %394 = vrot.lane.b32.xlu1 %v337_v21, %s1404_s16  ;;  %1215 = vrot.lane.b32.xlu0 %v1219_v22, %s1399_s11 }
 0x3cf   :  { %v798_v26 = vpop.permute.xlu1 %797 }
 0x3d0   :  { %v1736_v28 = vsel %vm81_vm0, 0.0, %v798_v26 }
 0x3d1   :  { %390 = vrot.lane.b32.xlu1 %v1714_v20, %s1404_s16  ;;  %1225 = vrot.lane.b32.xlu0 %v1219_v22, %s1401_s13  ;;  %v871_v44 = vrot.slane %v1736_v28, 4 }
 0x3d3   :  { %v800_v29 = vpop.permute.xlu1 %799 }
 0x3d4   :  { %v1723_v8 = vsel %vm81_vm0, %v798_v26, %v800_v29  ;;  %v806_v33 = vsel %vm81_vm0, %v800_v29, 0.0 }
 0x3d5   :  { %1230 = vrot.lane.b32.xlu0 %v1219_v22, %s1402_s14  ;;  %1240 = vrot.lane.b32.xlu1 %v1239_v27, %s1403_s15  ;;  %v1244_v53 = vpack.i.bf16 %v1723_v8, %v1714_v20  ;;  %v1269_v30 = vpack.i.bf16 %v1736_v28, %v806_v33  ;;  %v872_v43 = vrot.slane %v1723_v8, 4  ;;  %v873_v35 = vrot.slane %v806_v33, 4 }
 0x3d7   :  { %v1279_v34 = vpack.i.bf16 %v872_v43, %v402_v31  ;;  %v1294_v36 = vpack.i.bf16 %v871_v44, %v873_v35  ;;  %v1304_v37 = vpack.i.bf16 %v873_v35, %v872_v43 }
 0x3d9   :  { %392 = vrot.lane.b32.xlu0 %v1704_v56, %s1404_s16  ;;  %437 = vrot.lane.b32.xlu1 %v402_v31, %s1403_s15 }
 0x3dd   :  { %1245 = vrot.lane.b32.xlu1 %v1244_v53, %s1398_s1  ;;  %1235 = vrot.lane.b32.xlu0 %v1239_v27, %s1405_s17 }
 0x3e1   :  { %1250 = vrot.lane.b32.xlu1 %v1244_v53, %s1399_s11  ;;  %1265 = vrot.lane.b32.xlu0 %v1244_v53, %s1402_s14 }
 0x3e5   :  { %1255 = vrot.lane.b32.xlu1 %v1244_v53, %s1400_s12  ;;  %1270 = vrot.lane.b32.xlu0 %v1269_v30, %s1398_s1 }
 0x3e9   :  { %1260 = vrot.lane.b32.xlu1 %v1244_v53, %s1401_s13  ;;  %1280 = vrot.lane.b32.xlu0 %v1279_v34, %s1405_s17 }
 0x3ed   :  { %1275 = vrot.lane.b32.xlu1 %v1269_v30, %s1399_s11  ;;  %1285 = vrot.lane.b32.xlu0 %v1269_v30, %s1400_s12 }
 0x3f1   :  { %1290 = vrot.lane.b32.xlu1 %v1269_v30, %s1401_s13  ;;  %1295 = vrot.lane.b32.xlu0 %v1294_v36, %s1405_s17 }
 0x3f5   :  { %1305 = vrot.lane.b32.xlu1 %v1304_v37, %s1403_s15  ;;  %1300 = vrot.lane.b32.xlu0 %v1269_v30, %s1402_s14 }
 0x3f9   :  { %861 = vrot.lane.b32.xlu1 %v1723_v8, %s1404_s16  ;;  %906 = vrot.lane.b32.xlu0 %v871_v44, %s1403_s15 }
 0x3fd   :  { %859 = vrot.lane.b32.xlu1 %v1736_v28, %s1404_s16  ;;  %863 = vrot.lane.b32.xlu0 %v806_v33, %s1404_s16 }
 0x43b   :  { %v1757_v39 = vpop.permute.xlu1 %1220  ;;  %v1211_v40 = vpop.permute.xlu0 %1210 }
 0x43c   :  { %v1213_v32 = vunpack.i.h.bf16 %v1211_v40  ;;  %v1212_v11 = vunpack.i.l.bf16 %v1211_v40  ;;  %v1223_v50 = vunpack.i.h.bf16 %v1757_v39  ;;  %v1222_v54 = vunpack.i.l.bf16 %v1757_v39 }
 0x43e   :  { %v361_v59 = vsel %vm119_vm2, %v1212_v11, %v1213_v32  ;;  %v373_v63 = vsel %vm132_vm5, %v1222_v54, %v1223_v50  ;;  %v338_v32 = vsel %vm1535_vm1, %v1714_v20, 0.0 }
 0x43f   :  { %v395_v41 = vpop.permute.xlu1 %394  ;;  %v1759_v46 = vpop.permute.xlu0 %1215  ;;  %v365_v38 = vsel %vm1544_vm6, %v361_v59, 0.0  ;;  %v377_v17 = vsel %vm1540_vm4, %v373_v63, 0.0 }
 0x440   :  { %v1218_v55 = vunpack.i.h.bf16 %v1759_v46  ;;  %v1217_v57 = vunpack.i.l.bf16 %v1759_v46  ;;  %v418_v18 = vrot.slane %v365_v38, 4  ;;  %v434_v29 = vrot.slane %v377_v17, 4 }
 0x442   :  { %v349_v1 = vsel %vm106_vm3, %v1217_v57, %v1218_v55 }
 0x443   :  { %v391_v47 = vpop.permute.xlu1 %390  ;;  %v1761_v48 = vpop.permute.xlu0 %1225  ;;  %v353_v6 = vsel %vm1540_vm4, %v349_v1, 0.0 }
 0x444   :  { %v1228_v4 = vunpack.i.h.bf16 %v1761_v48  ;;  %v1227_v5 = vunpack.i.l.bf16 %v1761_v48  ;;  %v450_v27 = vsel %vm213_vm10, %v353_v6, %v418_v18 }
 0x446   :  { %v385_v19 = vsel %vm145_vm7, %v1227_v5, %v1228_v4 }
 0x447   :  { %v1763_v49 = vpop.permute.xlu0 %1230  ;;  %v1241_v42 = vpop.permute.xlu1 %1240  ;;  %v389_v53 = vsel %vm1544_vm6, %v385_v19, 0.0 }
 0x448   :  { %v1233_v12 = vunpack.i.h.bf16 %v1763_v49  ;;  %v1232_v7 = vunpack.i.l.bf16 %v1763_v49  ;;  %v1243_v13 = vunpack.i.h.bf16 %v1241_v42  ;;  %v1242_v15 = vunpack.i.l.bf16 %v1241_v42 }
 0x449   :  { %v807_v42 = vsel %vm1535_vm1, %v1736_v28, 0.0 }
 0x44a   :  { %v428_v24 = vsel %vm191_vm9, %v1232_v7, %v1233_v12  ;;  %v444_v26 = vsel %vm208_vm11, %v1242_v15, %v1243_v13 }
 0x44b   :  { %v393_v61 = vpop.permute.xlu0 %392  ;;  %v438_v62 = vpop.permute.xlu1 %437  ;;  %v1810_v35 = vsel %vm213_vm10, %v428_v24, %v434_v29  ;;  %v1813_v44 = vsel %vm213_vm10, %v389_v53, %v444_v26 }
 0x44c   :  { %v1806_v33 = vsel %vm158_vm13, %v391_v47, %v393_v61  ;;  %v1817_v46 = vsel %vm158_vm13, %v393_v61, %v395_v41  ;;  %v443_v50 = vsel %vm208_vm11, %v438_v62, %v1242_v15  ;;  %v808_v41 = vsel %vm1544_vm6, %v1723_v8, 0.0 }
 0x44d   :  { %v400_v59 = vsel %vm1559_vm8, %v1806_v33, 0.0  ;;  %v401_v1 = vsel %vm1540_vm4, %v1817_v46, 0.0 }
 0x44f   :  { %v1246_v0 = vpop.permute.xlu1 %1245  ;;  %v1778_v10 = vpop.permute.xlu0 %1235 }
 0x450   :  { %v1238_v9 = vunpack.i.h.bf16 %v1778_v10  ;;  %v1237_v16 = vunpack.i.l.bf16 %v1778_v10  ;;  %v1247_v56 = vunpack.i.l.bf16 %v1246_v0  ;;  %v1248_v47 = vunpack.i.h.bf16 %v1246_v0 }
 0x452   :  { %v412_v58 = vsel %vm174_vm12, %v1237_v16, %v1238_v9  ;;  %v360_v36 = vsel %vm119_vm2, %v1247_v56, %v1212_v11  ;;  %v1074_v11 = vpack.c.bf16 %v1813_v44, %v1810_v35 }
 0x453   :  { %v1793_v21 = vpop.permute.xlu1 %1250  ;;  %v1795_v22 = vpop.permute.xlu0 %1265  ;;  %v448_v23 = vsel %vm213_vm10, %v339_v14, %v412_v58 }
 0x454   :  { %v1070_v31 = vpack.c.bf16 %v450_v27, %v448_v23  ;;  %v1252_v30 = vunpack.i.l.bf16 %v1793_v21  ;;  %v1253_v38 = vunpack.i.h.bf16 %v1793_v21  ;;  %v1268_v0 = vunpack.i.h.bf16 %v1795_v22 }
 0x455   :  { %v1267_v10 = vunpack.i.l.bf16 %v1795_v22 }
 0x456   :  { %1071 = vmatprep.subr.bf16.mxu1 %v1070_v31  ;;  %v348_v62 = vsel %vm106_vm3, %v1252_v30, %v1217_v57 }
 0x457   :  { %v1256_v43 = vpop.permute.xlu1 %1255  ;;  %v1271_v34 = vpop.permute.xlu0 %1270  ;;  %v352_v6 = vsel %vm1559_vm8, %v348_v62, 0.0  ;;  %v427_v29 = vsel %vm191_vm9, %v1267_v10, %v1232_v7 }
 0x458   :  { %v1257_v37 = vunpack.i.l.bf16 %v1256_v43  ;;  %v1273_v39 = vunpack.i.h.bf16 %v1271_v34  ;;  %v1272_v40 = vunpack.i.l.bf16 %v1271_v34  ;;  %v1258_v15 = vunpack.i.h.bf16 %v1256_v43 }
 0x45a   :  { %v372_v55 = vsel %vm132_vm5, %v1257_v37, %v1222_v54  ;;  %v829_v20 = vsel %vm119_vm2, %v1273_v39, %v1248_v47  ;;  %v364_v54 = vsel %vm1535_vm1, %v360_v36, 0.0  ;;  %v830_v12 = vsel %vm119_vm2, %v1248_v47, %v1272_v40 }
 0x45b   :  { %v1836_v61 = vpop.permute.xlu1 %1260  ;;  %v1281_v63 = vpop.permute.xlu0 %1280  ;;  %v376_v4 = vsel %vm1559_vm8, %v372_v55, 0.0  ;;  %v833_v9 = vsel %vm1535_vm1, %v829_v20, 0.0  ;;  %v417_v17 = vrot.slane %v364_v54, 4  ;;  %v834_v58 = vsel %vm1544_vm6, %v830_v12, 0.0 }
 0x45c   :  { %v1262_v57 = vunpack.i.l.bf16 %v1836_v61  ;;  %v1282_v13 = vunpack.i.l.bf16 %v1281_v63  ;;  %v433_v14 = vrot.slane %v376_v4, 4  ;;  %v886_v31 = vrot.slane %v833_v9, 4 }
 0x45d   :  { %v449_v30 = vsel %vm213_vm10, %v352_v6, %v417_v17  ;;  %v887_v48 = vrot.slane %v834_v58, 4  ;;  %v1263_v37 = vunpack.i.h.bf16 %v1836_v61  ;;  %v1283_v39 = vunpack.i.h.bf16 %v1281_v63 }
 0x45e   :  { %v384_v18 = vsel %vm145_vm7, %v1262_v57, %v1227_v5  ;;  %v411_v23 = vsel %vm174_vm12, %v1282_v13, %v1237_v16  ;;  %v451_v47 = vsel %vm213_vm10, %v427_v29, %v433_v14 }
 0x45f   :  { %v1276_v19 = vpop.permute.xlu1 %1275  ;;  %v1286_v21 = vpop.permute.xlu0 %1285  ;;  %v447_v53 = vsel %vm213_vm10, %v338_v32, %v411_v23  ;;  %v388_v16 = vsel %vm1535_vm1, %v384_v18, 0.0 }
 0x460   :  { %v1278_v24 = vunpack.i.h.bf16 %v1276_v19  ;;  %v1277_v26 = vunpack.i.l.bf16 %v1276_v19  ;;  %v1288_v56 = vunpack.i.h.bf16 %v1286_v21  ;;  %v1287_v27 = vunpack.i.l.bf16 %v1286_v21 }
 0x461   :  { %v1072_v7 = vpack.c.bf16 %v449_v30, %v447_v53  ;;  %v453_v62 = vsel %vm213_vm10, %v388_v16, %v443_v50 }
 0x462   :  { %v817_v5 = vsel %vm106_vm3, %v1278_v24, %v1253_v38  ;;  %v842_v43 = vsel %vm132_vm5, %v1258_v15, %v1287_v27  ;;  %v818_v34 = vsel %vm106_vm3, %v1253_v38, %v1277_v26  ;;  %v841_v35 = vsel %vm132_vm5, %v1288_v56, %v1258_v15  ;;  %v73_v26 = vld [vmem:[%s1966_s2] sm:$0xf]  ;;  %s1407_s2 = smov [#allocation7]  }
 0x463   :  { %v846_v49 = vsel %vm1540_vm4, %v842_v43, 0.0  ;;  %v1291_v44 = vpop.permute.xlu1 %1290  ;;  %v1296_v36 = vpop.permute.xlu0 %1295  ;;  %1073 = vmatpush1.bf16.msra.mxu1 %v1072_v7  ;;  %v821_v54 = vsel %vm1559_vm8, %v817_v5, 0.0  ;;  %v845_v38 = vsel %vm1559_vm8, %v841_v35, 0.0  ;;  %v822_v61 = vsel %vm1540_vm4, %v818_v34, 0.0  ;;  %s1037_s20 = sshll.u32 %s1407_s2, 4  ;;  %s1038_s20 = int_to_ptr.vmem [resolvable:$true] %s1037_s20 }
 0x464   :  { %v1292_v40 = vunpack.i.l.bf16 %v1291_v44  ;;  %v1293_v32 = vunpack.i.h.bf16 %v1291_v44  ;;  %v1298_v55 = vunpack.i.h.bf16 %v1296_v36  ;;  %v1297_v20 = vunpack.i.l.bf16 %v1296_v36  ;;  %1075 = vmatprep.subr.bf16.mxu1 %v1074_v11  ;;  %s1365_s21 = scalar_lea.vmem %s1038_s20, 256  ;;  %p1370_p3 = scmp.lt.s32.totalorder %s1038_s20, %s1038_s20 }
 0x465   :  { %v903_v4 = vrot.slane %v846_v49, 4  ;;  %v1076_v57 = vpack.c.bf16 %v453_v62, %v451_v47  ;;  %v919_v58 = vsel %vm213_vm10, %v822_v61, %v887_v48  ;;  %v902_v23 = vrot.slane %v845_v38, 4  ;;  %p1366_p2 = scmp.ne.s32.totalorder %s1038_s20, %s1365_s21  ;;  %p1371_p4 = scmp.lt.s32.totalorder %s1365_s21, %s1365_s21 }
 0x466   :  { %v854_v63 = vsel %vm145_vm7, %v1263_v37, %v1292_v40  ;;  %v880_v12 = vsel %vm174_vm12, %v1298_v55, %v1283_v39  ;;  %v881_v10 = vsel %vm174_vm12, %v1283_v39, %v1297_v20  ;;  %v853_v14 = vsel %vm145_vm7, %v1293_v32, %v1263_v37 }
 0x467   :  { %v1306_v13 = vpop.permute.xlu1 %1305  ;;  %v1301_v50 = vpop.permute.xlu0 %1300  ;;  %1077 = vmatpush1.bf16.msra.mxu1 %v1076_v57  ;;  %v917_v11 = vsel %vm213_vm10, %v808_v41, %v881_v10  ;;  %v916_v18 = vsel %vm213_vm10, %v807_v42, %v880_v12  ;;  %v858_v41 = vsel %vm1544_vm6, %v854_v63, 0.0  ;;  %v918_v27 = vsel %vm213_vm10, %v821_v54, %v886_v31  ;;  %p1372_p5 = por %p1371_p4, %p1370_p3 }
 0x468   :  { %v1308_v15 = vunpack.i.h.bf16 %v1306_v13  ;;  %v1307_v9 = vunpack.i.l.bf16 %v1306_v13  ;;  %v1303_v6 = vunpack.i.h.bf16 %v1301_v50  ;;  %v1302_v17 = vunpack.i.l.bf16 %v1301_v50  ;;  %1053 = vmatprep.subr.msk.mxu1 %vm213_vm10, %v401_v1 }
 0x469   :  { %v1086_v8 = vpack.c.bf16 %v919_v58, %v917_v11  ;;  %v857_v1 = vsel %vm1535_vm1, %v853_v14, 0.0  ;;  %v1088_v29 = vpack.c.bf16 %v918_v27, %v916_v18  ;;  %p1373_p6 = pnand %p1372_p5, %p1366_p2 }
 0x46a   :  { %v913_v19 = vsel %vm208_vm11, %v1307_v9, %v1308_v15  ;;  %v897_v21 = vsel %vm191_vm9, %v1268_v0, %v1302_v17  ;;  %v896_v28 = vsel %vm191_vm9, %v1303_v6, %v1268_v0 }
 0x46b   :  { %v862_v42 = vpop.permute.xlu1 %861  ;;  %v907_v24 = vpop.permute.xlu0 %906  ;;  %v921_v56 = vsel %vm213_vm10, %v897_v21, %v903_v4  ;;  %v923_v46 = vsel %vm213_vm10, %v858_v41, %v913_v19  ;;  %1054 = vmatpush1.msk.msra.mxu1 %vm213_vm10, %v400_v59  ;;  %v920_v53 = vsel %vm213_vm10, %v896_v28, %v902_v23  ;;  %v1319_v19 = vld [vmem:[#allocation2] sm:$0xff] }
 0x46c   :  { %v912_v52 = vsel %vm208_vm11, %v907_v24, %v1307_v9  ;;  %v1090_v22 = vpack.c.bf16 %v923_v46, %v921_v56  ;;  %1055 = vmatmul.mubr.msk.f32.vlgmr.msra.gmra.mrb[0].mxu1 %vm222_vm14, %v73_v26  ;;  %1087 = vmatprep.subr.bf16.mxu1 %v1086_v8  ;;  %v1320_v56 = vld [vmem:[#allocation2 + $0x8] sm:$0xff] }
 0x46d   :  { %v922_v0 = vsel %vm213_vm10, %v857_v1, %v912_v52  ;;  %1089 = vmatpush1.bf16.msra.mxu1 %v1088_v29  ;;  %994 = vmatprep.mubr.f32.mxu1 %v1406_v25 }
 0x46e   :  { %v1092_v45 = vpack.c.bf16 %v922_v0, %v920_v53  ;;  %1091 = vmatprep.subr.bf16.mxu1 %v1090_v22 }
 0x46f   :  { %v864_v30 = vpop.permute.xlu0 %863  ;;  %v860_v31 = vpop.permute.xlu1 %859 }
 0x470   :  { %v866_v48 = vsel %vm158_vm13, %v862_v42, %v864_v30  ;;  %v865_v59 = vsel %vm158_vm13, %v860_v31, %v862_v42 }
 0x471   :  { %v870_v33 = vsel %vm1540_vm4, %v866_v48, 0.0  ;;  %1093 = vmatpush1.bf16.msra.mxu1 %v1092_v45  ;;  %v869_v5 = vsel %vm1559_vm8, %v865_v59, 0.0 }
 0x472   :  { %1059 = vmatprep.subr.msk.mxu1 %vm213_vm10, %v870_v33 }
 0x475   :  { %1060 = vmatpush1.msk.msra.mxu1 %vm213_vm10, %v869_v5 }
 0x476   :  { %1061 = vmatmul.mubr.msk.f32.vlgmr.msra.gmra.mrb[2].mxu1 %vm222_vm14, %v73_v26 }
 0x53f   :  { %v530_v25 = vpop.f32.mrb[0].mxu1 }
 0x540   :  { %v535_v43 = vsel %vm213_vm10, %v530_v25, 0.0  ;;  %v532_v16 = vpop.f32.mrb[1].mxu1 }
 0x541   :  { %v536_v34 = vsel %vm213_vm10, %v532_v16, 0.0 }
 0x542   :  { %v537_v51 = vadd.f32 %v536_v34, %v535_v43 }
 0x544   :  { %538 = vadd.xlane.f32.xlu0 %v537_v51 }
 0x549   :  { %v996_v35 = vpop.f32.mrb[2].mxu1 }
 0x54a   :  { %v1001_v49 = vsel %vm213_vm10, %v996_v35, 0.0  ;;  %v998_v7 = vpop.f32.mrb[3].mxu1 }
 0x54b   :  { %v1002_v44 = vsel %vm213_vm10, %v998_v7, 0.0 }
 0x54c   :  { %v1003_v60 = vadd.f32 %v1002_v44, %v1001_v49 }
 0x54e   :  { %1004 = vadd.xlane.f32.xlu1 %v1003_v60 }
 0x5d1   :  { %v539_v36 = vpop.xlane.xlu0 %538 }
 0x5d2   :  { %v540_v37 = vmul.f32 0.00390625, %v539_v36 }
 0x5d4   :  { %v541_v39 = vsub.f32 %v530_v25, %v540_v37  ;;  %v542_v40 = vsub.f32 %v532_v16, %v540_v37 }
 0x5d6   :  { %v543_v47 = vmul.f32 %v541_v39, %v541_v39  ;;  %v544_v32 = vmul.f32 %v542_v40, %v542_v40 }
 0x5d8   :  { %v545_v55 = vsel %vm213_vm10, %v543_v47, 0.0  ;;  %v546_v20 = vsel %vm213_vm10, %v544_v32, 0.0 }
 0x5d9   :  { %v547_v62 = vadd.f32 %v546_v20, %v545_v55 }
 0x5db   :  { %v1005_v54 = vpop.xlane.xlu1 %1004  ;;  %548 = vadd.xlane.f32.xlu0 %v547_v62 }
 0x5dc   :  { %v1006_v38 = vmul.f32 0.00390625, %v1005_v54 }
 0x5de   :  { %v1007_v4 = vsub.f32 %v996_v35, %v1006_v38  ;;  %v1008_v61 = vsub.f32 %v998_v7, %v1006_v38 }
 0x5e0   :  { %v1009_v63 = vmul.f32 %v1007_v4, %v1007_v4  ;;  %v1010_v12 = vmul.f32 %v1008_v61, %v1008_v61 }
 0x5e2   :  { %v1011_v10 = vsel %vm213_vm10, %v1009_v63, 0.0  ;;  %v1012_v57 = vsel %vm213_vm10, %v1010_v12, 0.0 }
 0x5e3   :  { %v1013_v13 = vadd.f32 %v1012_v57, %v1011_v10 }
 0x5e5   :  { %1014 = vadd.xlane.f32.xlu0 %v1013_v13 }
 0x668   :  { %v549_v50 = vpop.xlane.xlu0 %548 }
 0x669   :  { %v550_v15 = vmul.f32 0.00390625, %v549_v50 }
 0x66b   :  { %v551_v9 = vadd.f32 1e-05, %v550_v15 }
 0x66d   :  { %1315 = vrsqrt.f32 %v551_v9 }
 0x672   :  { %v1015_v6 = vpop.xlane.xlu0 %1014 }
 0x673   :  { %v1016_v17 = vmul.f32 0.00390625, %v1015_v6 }
 0x675   :  { %v1017_v14 = vadd.f32 1e-05, %v1016_v17 }
 0x677   :  { %v1316_v11 = vpop.eup %1315  ;;  %1317 = vrsqrt.f32 %v1017_v14 }
 0x678   :  { %v553_v58 = vmul.f32 %v1316_v11, %v541_v39  ;;  %v554_v18 = vmul.f32 %v1316_v11, %v542_v40 }
 0x67a   :  { %v556_v21 = vadd.f32 %v1319_v19, %v553_v58  ;;  %v557_v8 = vadd.f32 %v554_v18, %v1459_v3 }
 0x67c   :  { %v558_v41 = vmax.f32 %v556_v21, 0.0  ;;  %v559_v23 = vmax.f32 %v557_v8, 0.0 }
 0x67e   :  { %v562_v28 = vcombine.low %v558_v41, %v559_v23 }
 0x680   :  { %564 = vst [vmem:[#allocation7] sm:$0xff] %v562_v28 }
 0x681   :  { %v1318_v42 = vpop.eup %1317 }
 0x682   :  { %v1019_v24 = vmul.f32 %v1318_v42, %v1007_v4  ;;  %v1020_v26 = vmul.f32 %v1318_v42, %v1008_v61 }
 0x684   :  { %v1022_v46 = vadd.f32 %v1320_v56, %v1019_v24  ;;  %v1023_v1 = vadd.f32 %v1020_v26, %v1457_v2 }
 0x686   :  { %v1024_v52 = vmax.f32 %v1022_v46, 0.0  ;;  %v1025_v27 = vmax.f32 %v1023_v1, 0.0 }
 0x688   :  { %v1028_v22 = vcombine.low %v1024_v52, %v1025_v27 }
 0x68a   :  { %1031 = vst [vmem:[#allocation7 + $0x8] sm:$0xff] %v1028_v22 }
 0x68b   :  { %1376 = shalt.err (!%p1373_p6)
}
 0x68c   :  { %s1377_s26 = scalar_lea.hbm %s1967_s3, 256 }
 0x68d   :  { %p1378_p7 = scmp.ne.s32.totalorder %s1967_s3, %s1377_s26  ;;  %p1381_p8 = scmp.lt.u32.totalorder %s1377_s26, %s1967_s3 }
 0x68f   :  { %p1383_p9 = pnand %p1381_p8, %p1378_p7 }
 0x691   :  { %1386 = shalt.err (!%p1383_p9)
}
 0x692   :  { %1043 = dma.vmem_to_hbm [thread:$0]  %s1038_s20, 256, %s1967_s3, [#allocation4], %s1394_s22, %s1394_s22, %s1395_s23  }
 0x693   :  { %1391 = dma.done.wait [#allocation4], 256  }
 0x694   :  { %1392 = vsyncadd [#allocation4], 4294967040 }
 0x695   :  { %1047 = vsyncpa [#allocation3], 1 }
 0x696   :  { %1048 = vsyncpa [#allocation6], 1 }
 0x697   :  { %1049 = vsyncpa [#allocation4], 1 }

</bundles_post_ra>
